<compile_context>
chip_gen: v7x
topology: tpu7x:2x2x1
jax: 0.10.0
libtpu: 0.0.40
codegen_flags: <defaults>
</compile_context>

<pallas_src>
import jax
import jax.numpy as jnp
from jax.experimental import pallas as pl
from jax.experimental.pallas import tpu as pltpu

D_IN = 28 * 28            # 784 — contraction dim needs no 128-alignment
H1, H1_P = 300, 384
H2, H2_P = 200, 256
D_OUT, D_OUT_P = 10, 128


def _round_up(x, m):
    return (x + m - 1) // m * m


def _has_bf16_vpu():
    """v2..v5 lack bf16 VPU/EUP — keep activation math in f32 there."""
    try:
        kind = jax.devices()[0].device_kind.lower()
    except Exception:
        return True
    return not any(v in kind for v in ("v2", "v3", "v4", "v5"))


def _sigmoid(x):
    # One EUP push (tanh) instead of exp + reciprocal (two pushes).
    return 0.5 * (jnp.tanh(0.5 * x) + 1.0)


def _make_kernel(act_dtype):
    def mlp_kernel(x_ref, w1_ref, b1_ref, w2_ref, b2_ref, w3_ref, b3_ref,
                   out_ref):
        # Cast f32 activations -> bf16 on the VPU (no host-side HBM pass).
        x = x_ref[...].astype(jnp.bfloat16)
        # layer 1: (TM, 784) @ (784, 384), f32 accumulation on the MXU.
        h = jnp.dot(x, w1_ref[...], preferred_element_type=jnp.float32)
        h = _sigmoid(h.astype(act_dtype) + b1_ref[...].astype(act_dtype))
        # layer 2: (TM, 384) @ (384, 256)
        h = jnp.dot(h.astype(jnp.bfloat16), w2_ref[...],
                    preferred_element_type=jnp.float32)
        h = _sigmoid(h.astype(act_dtype) + b2_ref[...].astype(act_dtype))
        # layer 3 (logits): (TM, 256) @ (256, 128), bias/out in f32.
        logits = jnp.dot(h.astype(jnp.bfloat16), w3_ref[...],
                         preferred_element_type=jnp.float32)
        out_ref[...] = logits + b3_ref[...]
    return mlp_kernel


def _resident_spec(shape):
    """Constant block index -> stays in VMEM across all grid steps.
    Single-buffered (no need to double-buffer constant weights)."""
    idx = lambda i: (0,) * len(shape)
    try:
        return pl.BlockSpec(shape, idx, pipeline_mode=pl.Buffered(1))
    except TypeError:  # older BlockSpec without pipeline_mode
        return pl.BlockSpec(shape, idx)


def _pick_tm(b_pad, cap_rows=1024):
    """Largest multiple-of-128 tile <= cap_rows that divides b_pad while
    keeping >= 2 grid steps (so 'parallel' shards across TCs on v7x)."""
    n = b_pad // 128
    cap = max(1, cap_rows // 128)
    for d in range(min(cap, n), 0, -1):
        if n % d == 0 and n // d >= 2:
            return 128 * d
    return 128 * min(cap, n)  # only reached when b_pad == 128


def neural_network_forward(x, padded_params, *, tm_cap=1024):
    """x: (B, 1, 28, 28) float32 (NCHW, as the PyTorch module expects)."""
    w1, b1, w2, b2, w3, b3 = padded_params
    B = x.shape[0]
    # nn.Flatten(): contiguous reshape -> free view, no extra HBM traffic.
    x2d = x.reshape(B, D_IN)

    # Pad batch to a multiple of 128 rows (MXU height / bf16 sublane packing),
    # decoupled from TM so ragged batches don't round up to a whole tile.
    B_pad = _round_up(max(B, 128), 128)
    if B_pad != B:
        x2d = jnp.pad(x2d, ((0, B_pad - B), (0, 0)))

    TM = _pick_tm(B_pad, tm_cap)
    grid = (B_pad // TM,)

    act_dtype = jnp.bfloat16 if _has_bf16_vpu() else jnp.float32

    out = pl.pallas_call(
        _make_kernel(act_dtype),
        out_shape=jax.ShapeDtypeStruct((B_pad, D_OUT_P), jnp.float32),
        grid=grid,
        in_specs=[
            pl.BlockSpec((TM, D_IN), lambda i: (i, 0)),   # activations: tiled
            _resident_spec(w1.shape), _resident_spec(b1.shape),
            _resident_spec(w2.shape), _resident_spec(b2.shape),
            _resident_spec(w3.shape), _resident_spec(b3.shape),
        ],
        out_specs=pl.BlockSpec((TM, D_OUT_P), lambda i: (i, 0)),
        compiler_params=pltpu.CompilerParams(
            dimension_semantics=("parallel",),
            vmem_limit_bytes=32 * 1024 * 1024),
    )(x2d, w1, b1, w2, b2, w3, b3)

    # TODO(synk): on mem-bound v6e a bf16 logits writeback would shave ~10% of
    # kernel HBM traffic; kept f32 here for output fidelity.
    return out[:B, :D_OUT]


def init_params(key):
    """Unpadded f32 params matching the PyTorch module.

    PyTorch: w1.weight ~ U(-1, 1) (explicit init); w2/w3 and all biases use the
    default nn.Linear init U(-1/sqrt(fan_in), 1/sqrt(fan_in)).
    Weights stored transposed: (in_features, out_features).
    """
    k1, k2, k3, k4, k5, k6 = jax.random.split(key, 6)

    def u(k, shape, bound):
        return jax.random.uniform(k, shape, jnp.float32, -bound, bound)

    w1 = u(k1, (D_IN, H1), 1.0)
    b1 = u(k2, (1, H1), 1.0 / jnp.sqrt(float(D_IN)))
    w2 = u(k3, (H1, H2), 1.0 / jnp.sqrt(float(H1)))
    b2 = u(k4, (1, H2), 1.0 / jnp.sqrt(float(H1)))
    w3 = u(k5, (H2, D_OUT), 1.0 / jnp.sqrt(float(H2)))
    b3 = u(k6, (1, D_OUT), 1.0 / jnp.sqrt(float(H2)))
    return (w1, b1, w2, b2, w3, b3)


def pad_and_cast_params(params):
    """Zero-pad output dims to lane-aligned widths (bf16 weights, f32 biases).
    Padded hidden columns give sigmoid(0)=0.5 activations, but they only ever
    multiply zero-padded weight rows of the next layer, so they contribute 0."""
    w1, b1, w2, b2, w3, b3 = params

    def pad2(a, r, c):
        return jnp.pad(a, ((0, r - a.shape[0]), (0, c - a.shape[1])))

    w1p = pad2(w1, D_IN, H1_P).astype(jnp.bfloat16)   # (784, 384) — no K pad
    b1p = pad2(b1, 1, H1_P)
    w2p = pad2(w2, H1_P, H2_P).astype(jnp.bfloat16)
    b2p = pad2(b2, 1, H2_P)
    w3p = pad2(w3, H2_P, D_OUT_P).astype(jnp.bfloat16)
    b3p = pad2(b3, 1, D_OUT_P)
    return (w1p, b1p, w2p, b2p, w3p, b3p)


def reference_forward_f32(x, params):
    """Pure-f32 JAX reference (semantics of the PyTorch module)."""
    w1, b1, w2, b2, w3, b3 = params
    xf = x.reshape(x.shape[0], -1).astype(jnp.float32)
    h1 = jax.nn.sigmoid(xf @ w1 + b1)
    h2 = jax.nn.sigmoid(h1 @ w2 + b2)
    return h2 @ w3 + b3


def reference_forward_matched(x, padded_params, act_dtype):
    """Reference mirroring the kernel's exact dtype path (bf16 matmul operands,
    f32 accumulation, activations in act_dtype, tanh-form sigmoid)."""
    w1, b1, w2, b2, w3, b3 = padded_params
    B = x.shape[0]
    xb = x.reshape(B, D_IN).astype(jnp.bfloat16)
    h = jnp.dot(xb, w1, preferred_element_type=jnp.float32)
    h = _sigmoid(h.astype(act_dtype) + b1.astype(act_dtype))
    h = jnp.dot(h.astype(jnp.bfloat16), w2, preferred_element_type=jnp.float32)
    h = _sigmoid(h.astype(act_dtype) + b2.astype(act_dtype))
    logits = jnp.dot(h.astype(jnp.bfloat16), w3,
                     preferred_element_type=jnp.float32) + b3
    return logits[:, :D_OUT]


if __name__ == "__main__":
    key = jax.random.PRNGKey(0)
    k_params, k_x1, k_x2 = jax.random.split(key, 3)

    params = init_params(k_params)
    padded_params = pad_and_cast_params(params)
    act_dtype = jnp.bfloat16 if _has_bf16_vpu() else jnp.float32

    # Small MNIST-like NCHW batch, as the PyTorch forward implies.
    x = jax.random.normal(k_x1, (2, 1, 28, 28), dtype=jnp.float32)
    logits = jax.block_until_ready(neural_network_forward(x, padded_params))
    assert logits.shape == (2, 10)

    # Tight check vs a reference with the identical quantization path.
    ref_q = reference_forward_matched(x, padded_params, act_dtype)
    assert jnp.allclose(logits, ref_q, atol=1e-2, rtol=1e-2), \
        "mismatch vs dtype-matched reference"

    # Loose check vs the pure-f32 PyTorch-equivalent reference
    # (bf16 weight/input quantization is the accepted precision change).
    ref_f = reference_forward_f32(x, params)
    assert jnp.allclose(logits, ref_f, atol=5e-2, rtol=5e-2), \
        "mismatch vs f32 reference"

    # Ragged batch (200 -> padded to 256, two 128-row grid steps) exercises the
    # multi-step / megacore path.
    xb = jax.random.normal(k_x2, (200, 1, 28, 28), dtype=jnp.float32)
    logits_b = jax.block_until_ready(neural_network_forward(xb, padded_params))
    assert logits_b.shape == (200, 10)
    ref_qb = reference_forward_matched(xb, padded_params, act_dtype)
    assert jnp.allclose(logits_b, ref_qb, atol=1e-2, rtol=1e-2), \
        "mismatch on ragged batch"

    print("KERNEL_OK")
</pallas_src>

<mosaic_0001>
module attributes {stable_mosaic.version = 11 : i64} {
  func.func @mlp_kernel(%arg0: i32, %arg1: memref<128x784xf32, #tpu.memory_space<vmem>>, %arg2: memref<784x384xbf16, #tpu.memory_space<vmem>>, %arg3: memref<1x384xf32, #tpu.memory_space<vmem>>, %arg4: memref<384x256xbf16, #tpu.memory_space<vmem>>, %arg5: memref<1x256xf32, #tpu.memory_space<vmem>>, %arg6: memref<256x128xbf16, #tpu.memory_space<vmem>>, %arg7: memref<1x128xf32, #tpu.memory_space<vmem>>, %arg8: memref<128x128xf32, #tpu.memory_space<vmem>>) attributes {dimension_semantics = [#tpu.dimension_semantics<parallel>], iteration_bounds = array<i64: 1>, scalar_prefetch = 0 : i64, scratch_operands = 0 : i64, tpu.core_type = #tpu.core_type<tc>, window_params = [{transform_indices = @transform_0, window_bounds = array<i64: 128, 784>}, {pipeline_mode = #tpu.pipeline_mode<synchronous>, transform_indices = @transform_1, window_bounds = array<i64: 784, 384>}, {pipeline_mode = #tpu.pipeline_mode<synchronous>, transform_indices = @transform_2, window_bounds = array<i64: 1, 384>}, {pipeline_mode = #tpu.pipeline_mode<synchronous>, transform_indices = @transform_3, window_bounds = array<i64: 384, 256>}, {pipeline_mode = #tpu.pipeline_mode<synchronous>, transform_indices = @transform_4, window_bounds = array<i64: 1, 256>}, {pipeline_mode = #tpu.pipeline_mode<synchronous>, transform_indices = @transform_5, window_bounds = array<i64: 256, 128>}, {pipeline_mode = #tpu.pipeline_mode<synchronous>, transform_indices = @transform_6, window_bounds = array<i64: 1, 128>}, {transform_indices = @transform_7, window_bounds = array<i64: 128, 128>}]} {
    %c0 = arith.constant 0 : index
    %c0_0 = arith.constant 0 : index
    %0 = vector.load %arg1[%c0, %c0_0] : memref<128x784xf32, #tpu.memory_space<vmem>>, vector<128x784xf32>
    %1 = arith.truncf %0 : vector<128x784xf32> to vector<128x784xbf16>
    %c0_1 = arith.constant 0 : index
    %c0_2 = arith.constant 0 : index
    %2 = vector.load %arg2[%c0_1, %c0_2] : memref<784x384xbf16, #tpu.memory_space<vmem>>, vector<784x384xbf16>
    %cst = arith.constant dense<0.000000e+00> : vector<128x384xf32>
    %3 = tpu.matmul %1, %2, %cst {dimension_numbers = #tpu.dot_dimension_numbers<[1], [0], [0], [1], [0, 0, 1, 1], [], []>} : vector<128x784xbf16>, vector<784x384xbf16>, vector<128x384xf32> -> vector<128x384xf32>
    %4 = arith.truncf %3 : vector<128x384xf32> to vector<128x384xbf16>
    %c0_3 = arith.constant 0 : index
    %c0_4 = arith.constant 0 : index
    %5 = vector.load %arg3[%c0_3, %c0_4] : memref<1x384xf32, #tpu.memory_space<vmem>>, vector<1x384xf32>
    %6 = arith.truncf %5 : vector<1x384xf32> to vector<1x384xbf16>
    %7 = vector.broadcast %6 : vector<1x384xbf16> to vector<128x384xbf16>
    %8 = arith.addf %4, %7 : vector<128x384xbf16>
    %cst_5 = arith.constant 5.000000e-01 : bf16
    %9 = vector.broadcast %cst_5 : bf16 to vector<128x384xbf16>
    %10 = arith.mulf %9, %8 : vector<128x384xbf16>
    %11 = math.tanh %10 : vector<128x384xbf16>
    %cst_6 = arith.constant 1.000000e+00 : bf16
    %12 = vector.broadcast %cst_6 : bf16 to vector<128x384xbf16>
    %13 = arith.addf %11, %12 : vector<128x384xbf16>
    %cst_7 = arith.constant 5.000000e-01 : bf16
    %14 = vector.broadcast %cst_7 : bf16 to vector<128x384xbf16>
    %15 = arith.mulf %14, %13 : vector<128x384xbf16>
    %c0_8 = arith.constant 0 : index
    %c0_9 = arith.constant 0 : index
    %16 = vector.load %arg4[%c0_8, %c0_9] : memref<384x256xbf16, #tpu.memory_space<vmem>>, vector<384x256xbf16>
    %cst_10 = arith.constant dense<0.000000e+00> : vector<128x256xf32>
    %17 = tpu.matmul %15, %16, %cst_10 {dimension_numbers = #tpu.dot_dimension_numbers<[1], [0], [0], [1], [0, 0, 1, 1], [], []>} : vector<128x384xbf16>, vector<384x256xbf16>, vector<128x256xf32> -> vector<128x256xf32>
    %18 = arith.truncf %17 : vector<128x256xf32> to vector<128x256xbf16>
    %c0_11 = arith.constant 0 : index
    %c0_12 = arith.constant 0 : index
    %19 = vector.load %arg5[%c0_11, %c0_12] : memref<1x256xf32, #tpu.memory_space<vmem>>, vector<1x256xf32>
    %20 = arith.truncf %19 : vector<1x256xf32> to vector<1x256xbf16>
    %21 = vector.broadcast %20 : vector<1x256xbf16> to vector<128x256xbf16>
    %22 = arith.addf %18, %21 : vector<128x256xbf16>
    %cst_13 = arith.constant 5.000000e-01 : bf16
    %23 = vector.broadcast %cst_13 : bf16 to vector<128x256xbf16>
    %24 = arith.mulf %23, %22 : vector<128x256xbf16>
    %25 = math.tanh %24 : vector<128x256xbf16>
    %cst_14 = arith.constant 1.000000e+00 : bf16
    %26 = vector.broadcast %cst_14 : bf16 to vector<128x256xbf16>
    %27 = arith.addf %25, %26 : vector<128x256xbf16>
    %cst_15 = arith.constant 5.000000e-01 : bf16
    %28 = vector.broadcast %cst_15 : bf16 to vector<128x256xbf16>
    %29 = arith.mulf %28, %27 : vector<128x256xbf16>
    %c0_16 = arith.constant 0 : index
    %c0_17 = arith.constant 0 : index
    %30 = vector.load %arg6[%c0_16, %c0_17] : memref<256x128xbf16, #tpu.memory_space<vmem>>, vector<256x128xbf16>
    %cst_18 = arith.constant dense<0.000000e+00> : vector<128x128xf32>
    %31 = tpu.matmul %29, %30, %cst_18 {dimension_numbers = #tpu.dot_dimension_numbers<[1], [0], [0], [1], [0, 0, 1, 1], [], []>} : vector<128x256xbf16>, vector<256x128xbf16>, vector<128x128xf32> -> vector<128x128xf32>
    %c0_19 = arith.constant 0 : index
    %c0_20 = arith.constant 0 : index
    %32 = vector.load %arg7[%c0_19, %c0_20] : memref<1x128xf32, #tpu.memory_space<vmem>>, vector<1x128xf32>
    %33 = vector.broadcast %32 : vector<1x128xf32> to vector<128x128xf32>
    %34 = arith.addf %31, %33 : vector<128x128xf32>
    %c0_21 = arith.constant 0 : index
    %c0_22 = arith.constant 0 : index
    %35 = vector.load %arg8[%c0_21, %c0_22] : memref<128x128xf32, #tpu.memory_space<vmem>>, vector<128x128xf32>
    tpu.vector_store %arg8[%c0_21, %c0_22], %34 {strides = array<i32>} : memref<128x128xf32, #tpu.memory_space<vmem>>, vector<128x128xf32>,
    return
  }
  func.func @transform_0(%arg0: i32) -> (i32, i32) {
    %c0_i32 = arith.constant 0 : i32
    %c0_i32_0 = arith.constant 0 : i32
    return %arg0, %c0_i32 : i32, i32
  }
  func.func @transform_1(%arg0: i32) -> (i32, i32) {
    %c0_i32 = arith.constant 0 : i32
    %c0_i32_0 = arith.constant 0 : i32
    %c0_i32_1 = arith.constant 0 : i32
    return %c0_i32, %c0_i32_0 : i32, i32
  }
  func.func @transform_2(%arg0: i32) -> (i32, i32) {
    %c0_i32 = arith.constant 0 : i32
    %c0_i32_0 = arith.constant 0 : i32
    %c0_i32_1 = arith.constant 0 : i32
    return %c0_i32, %c0_i32_0 : i32, i32
  }
  func.func @transform_3(%arg0: i32) -> (i32, i32) {
    %c0_i32 = arith.constant 0 : i32
    %c0_i32_0 = arith.constant 0 : i32
    %c0_i32_1 = arith.constant 0 : i32
    return %c0_i32, %c0_i32_0 : i32, i32
  }
  func.func @transform_4(%arg0: i32) -> (i32, i32) {
    %c0_i32 = arith.constant 0 : i32
    %c0_i32_0 = arith.constant 0 : i32
    %c0_i32_1 = arith.constant 0 : i32
    return %c0_i32, %c0_i32_0 : i32, i32
  }
  func.func @transform_5(%arg0: i32) -> (i32, i32) {
    %c0_i32 = arith.constant 0 : i32
    %c0_i32_0 = arith.constant 0 : i32
    %c0_i32_1 = arith.constant 0 : i32
    return %c0_i32, %c0_i32_0 : i32, i32
  }
  func.func @transform_6(%arg0: i32) -> (i32, i32) {
    %c0_i32 = arith.constant 0 : i32
    %c0_i32_0 = arith.constant 0 : i32
    %c0_i32_1 = arith.constant 0 : i32
    return %c0_i32, %c0_i32_0 : i32, i32
  }
  func.func @transform_7(%arg0: i32) -> (i32, i32) {
    %c0_i32 = arith.constant 0 : i32
    %c0_i32_0 = arith.constant 0 : i32
    return %arg0, %c0_i32 : i32, i32
  }
}

</mosaic_0001>

<bundles_post_ra>
// kernel: tpu_custom_call.1
= control target key start
LH: loop header
LB: loop body
LE: loop exit
PB: predicated region body
PF: predicated region fallthrough
CT: control target
= control target key end

     0   :  { %s5601_s0 = inlined_call_operand.vmem [shape: f32[128,784], index: 0, kind: input, shape index: {}]   ;;  %s5602_s1 = inlined_call_operand.vmem [shape: bf16[784,384], index: 1, kind: input, shape index: {}]   ;;  %s5603_s2 = inlined_call_operand.vmem [shape: f32[1,384], index: 2, kind: input, shape index: {}]   ;;  %s5604_s3 = inlined_call_operand.vmem [shape: bf16[384,256], index: 3, kind: input, shape index: {}]   ;;  %s5605_s4 = inlined_call_operand.vmem [shape: f32[1,256], index: 4, kind: input, shape index: {}]   ;;  %s5606_s5 = inlined_call_operand.vmem [shape: bf16[256,128], index: 5, kind: input, shape index: {}]   ;;  %s5607_s6 = inlined_call_operand.vmem [shape: f32[1,128], index: 6, kind: input, shape index: {}]   ;;  %s5608_s7 = inlined_call_operand.hbm [shape: f32[128,128], index: 7, kind: output, shape index: {}]  }
   0x1   :  { %v3773_v0 = vld [vmem:[%s5602_s1 + $0x4] ss:$12 sps:$4 sm:$0xff]   ;;  %v3775_v1 = vld [vmem:[%s5602_s1 + $0xc8] ss:$12 sps:$4 sm:$0xff]   ;;  %v3776_v2 = vld [vmem:[%s5602_s1] ss:$12 sps:$4 sm:$0xff]  }
   0x2   :  { %1203 = vmatprep.subr.bf16.mxu0 %v3773_v0  ;;  %3358 = vmatprep.subr.bf16.mxu1 %v3775_v1  ;;  %v3777_v3 = vld [vmem:[%s5602_s1 + $0x8] ss:$12 sps:$4 sm:$0xff]   ;;  %v3780_v5 = vld [vmem:[%s5602_s1 + $0xe0] ss:$12 sps:$4 sm:$0xff]   ;;  %v3781_v6 = vld [vmem:[%s5602_s1 + $0x18] ss:$12 sps:$4 sm:$0xff]  }
   0x3   :  { %1204 = vmatpush1.bf16.msra.mxu0 %v3776_v2  ;;  %v3778_v4 = vld [vmem:[%s5602_s1 + $0x1c] ss:$12 sps:$4 sm:$0xff]   ;;  %3359 = vmatpush3.bf16.msra.mxu1 %v3777_v3  ;;  %v3782_v7 = vld [vmem:[%s5602_s1 + $0x20] ss:$12 sps:$4 sm:$0xff]   ;;  %v3785_v9 = vld [vmem:[%s5602_s1 + $0xf8] ss:$12 sps:$4 sm:$0xff]  }
   0x4   :  { %1205 = vmatprep.subr.bf16.mxu0 %v3778_v4  ;;  %3360 = vmatprep.subr.bf16.mxu1 %v3780_v5  ;;  %v3783_v8 = vld [vmem:[%s5602_s1 + $0x34] ss:$12 sps:$4 sm:$0xff]   ;;  %v3786_v10 = vld [vmem:[%s5602_s1 + $0x30] ss:$12 sps:$4 sm:$0xff]   ;;  %v3787_v11 = vld [vmem:[%s5602_s1 + $0x38] ss:$12 sps:$4 sm:$0xff]  }
   0x5   :  { %v3788_v12 = vld [vmem:[%s5602_s1 + $0x4c] ss:$12 sps:$4 sm:$0xff]   ;;  %v3790_v13 = vld [vmem:[%s5602_s1 + $0x110] ss:$12 sps:$4 sm:$0xff]   ;;  %v3791_v14 = vld [vmem:[%s5602_s1 + $0x48] ss:$12 sps:$4 sm:$0xff]  }
   0x6   :  { %v3792_v15 = vld [vmem:[%s5602_s1 + $0x50] ss:$12 sps:$4 sm:$0xff]   ;;  %v3795_v17 = vld [vmem:[%s5602_s1 + $0x128] ss:$12 sps:$4 sm:$0xff]   ;;  %v3796_v18 = vld [vmem:[%s5602_s1 + $0x60] ss:$12 sps:$4 sm:$0xff]  }
   0x7   :  { %1206 = vmatpush1.bf16.msra.mxu0 %v3781_v6  ;;  %3361 = vmatpush3.bf16.msra.mxu1 %v3782_v7  ;;  %v3793_v16 = vld [vmem:[%s5602_s1 + $0x64] ss:$12 sps:$4 sm:$0xff]   ;;  %v3797_v19 = vld [vmem:[%s5602_s1 + $0x68] ss:$12 sps:$4 sm:$0xff]   ;;  %v3800_v21 = vld [vmem:[%s5602_s1 + $0x140] ss:$12 sps:$4 sm:$0xff]  }
   0x8   :  { %1207 = vmatprep.subr.bf16.mxu0 %v3783_v8  ;;  %3362 = vmatprep.subr.bf16.mxu1 %v3785_v9  ;;  %v3798_v20 = vld [vmem:[%s5602_s1 + $0x7c] ss:$12 sps:$4 sm:$0xff]   ;;  %v3801_v22 = vld [vmem:[%s5602_s1 + $0x78] ss:$12 sps:$4 sm:$0xff]   ;;  %v3802_v23 = vld [vmem:[%s5602_s1 + $0x80] ss:$12 sps:$4 sm:$0xff]  }
   0x9   :  { %v3803_v24 = vld [vmem:[%s5602_s1 + $0x94] ss:$12 sps:$4 sm:$0xff]   ;;  %v3805_v25 = vld [vmem:[%s5602_s1 + $0x158] ss:$12 sps:$4 sm:$0xff]   ;;  %v3806_v26 = vld [vmem:[%s5602_s1 + $0x90] ss:$12 sps:$4 sm:$0xff]  }
   0xa   :  { %v3807_v27 = vld [vmem:[%s5602_s1 + $0x98] ss:$12 sps:$4 sm:$0xff]   ;;  %v3810_v29 = vld [vmem:[%s5602_s1 + $0x170] ss:$12 sps:$4 sm:$0xff]   ;;  %v3811_v30 = vld [vmem:[%s5602_s1 + $0xa8] ss:$12 sps:$4 sm:$0xff]  }
   0xb   :  { %1208 = vmatpush1.bf16.msra.mxu0 %v3786_v10  ;;  %3363 = vmatpush3.bf16.msra.mxu1 %v3787_v11  ;;  %v3808_v28 = vld [vmem:[%s5602_s1 + $0xac] ss:$12 sps:$4 sm:$0xff]   ;;  %v38_v32 = vld [vmem:[%s5601_s0 + $0x40] sm:$0xff]  ;;  %v3812_v33 = vld [vmem:[%s5602_s1 + $0xb0] ss:$12 sps:$4 sm:$0xff]  }
   0xc   :  { %1209 = vmatprep.subr.bf16.mxu0 %v3788_v12  ;;  %3364 = vmatprep.subr.bf16.mxu1 %v3790_v13  ;;  %v31_v31 = vld [vmem:[%s5601_s0 + $0x8] sm:$0xff]  ;;  %v3813_v35 = vld [vmem:[%s5602_s1 + $0xc4] ss:$12 sps:$4 sm:$0xff]   ;;  %v37_v37 = vld [vmem:[%s5601_s0 + $0x38] sm:$0xff] }
   0xd   :  { %v143_v34 = vpack.c.bf16 %v38_v32, %v31_v31  ;;  %v30_v36 = vld [vmem:[%s5601_s0] sm:$0xff]  ;;  %v45_v38 = vld [vmem:[%s5601_s0 + $0x78] sm:$0xff]  ;;  %v52_v39 = vld [vmem:[%s5601_s0 + $0xb0] sm:$0xff] }
   0xe   :  { %v4322_v40 = vpack.c.bf16 %v37_v37, %v30_v36  ;;  %v3815_v41 = vld [vmem:[%s5602_s1 + $0xc0] ss:$12 sps:$4 sm:$0xff]   ;;  %v3816_v42 = vld [vmem:[%s5602_s1 + $0xdc] ss:$12 sps:$4 sm:$0xff]   ;;  %v4330_v43 = vpack.c.bf16 %v52_v39, %v45_v38  ;;  %v3818_v44 = vld [vmem:[%s5602_s1 + $0xd8] ss:$12 sps:$4 sm:$0xff]  }
   0xf   :  { %1210 = vmatpush1.bf16.msra.mxu0 %v3791_v14  ;;  %3365 = vmatpush3.bf16.msra.mxu1 %v3792_v15  ;;  %v3819_v45 = vld [vmem:[%s5602_s1 + $0xf4] ss:$12 sps:$4 sm:$0xff]   ;;  %v51_v47 = vld [vmem:[%s5601_s0 + $0xa8] sm:$0xff]  ;;  %v3821_v51 = vld [vmem:[%s5602_s1 + $0xf0] ss:$12 sps:$4 sm:$0xff]  }
  0x10   :  { %1211 = vmatprep.subr.bf16.mxu0 %v3793_v16  ;;  %3366 = vmatprep.subr.bf16.mxu1 %v3795_v17  ;;  %v44_v46 = vld [vmem:[%s5601_s0 + $0x70] sm:$0xff]  ;;  %v59_v48 = vld [vmem:[%s5601_s0 + $0xe8] sm:$0xff]  ;;  %v66_v49 = vld [vmem:[%s5601_s0 + $0x120] sm:$0xff] }
  0x11   :  { %1687 = vmatprep.mubr.bf16.mxu1 %v143_v34  ;;  %1235 = vmatprep.mubr.bf16.mxu0 %v143_v34  ;;  %v4352_v50 = vpack.c.bf16 %v51_v47, %v44_v46  ;;  %v3822_v52 = vld [vmem:[%s5602_s1 + $0x10c] ss:$12 sps:$4 sm:$0xff]   ;;  %v4360_v53 = vpack.c.bf16 %v66_v49, %v59_v48  ;;  %v3824_v54 = vld [vmem:[%s5602_s1 + $0x108] ss:$12 sps:$4 sm:$0xff]   ;;  %v3825_v55 = vld [vmem:[%s5602_s1 + $0x124] ss:$12 sps:$4 sm:$0xff]  }
  0x12   :  { %v58_v56 = vld [vmem:[%s5601_s0 + $0xe0] sm:$0xff]  ;;  %v65_v57 = vld [vmem:[%s5601_s0 + $0x118] sm:$0xff]  ;;  %v80_v59 = vld [vmem:[%s5601_s0 + $0x190] sm:$0xff] }
  0x13   :  { %1212 = vmatpush1.bf16.msra.mxu0 %v3796_v18  ;;  %3367 = vmatpush3.bf16.msra.mxu1 %v3797_v19  ;;  %v73_v58 = vld [vmem:[%s5601_s0 + $0x158] sm:$0xff]  ;;  %v3840_v60 = vld [vmem:[%s5602_s1 + $0x248] ss:$12 sps:$4 sm:$0xff]   ;;  %v4388_v62 = vpack.c.bf16 %v65_v57, %v58_v56  ;;  %v3827_v63 = vld [vmem:[%s5602_s1 + $0x120] ss:$12 sps:$4 sm:$0xff]  }
  0x14   :  { %1213 = vmatprep.subr.bf16.mxu0 %v3798_v20  ;;  %3368 = vmatprep.subr.bf16.mxu1 %v3800_v21  ;;  %v3841_v61 = vld [vmem:[%s5602_s1 + $0x188] ss:$12 sps:$4 sm:$0xff]   ;;  %v4396_v1 = vpack.c.bf16 %v80_v59, %v73_v58  ;;  %v3845_v2 = vld [vmem:[%s5602_s1 + $0x260] ss:$12 sps:$4 sm:$0xff]   ;;  %v3830_v3 = vld [vmem:[%s5602_s1 + $0x138] ss:$12 sps:$4 sm:$0xff]  }
  0x15   :  { %v3828_v0 = vld [vmem:[%s5602_s1 + $0x13c] ss:$12 sps:$4 sm:$0xff]   ;;  %v3846_v4 = vld [vmem:[%s5602_s1 + $0x1a0] ss:$12 sps:$4 sm:$0xff]   ;;  %v72_v6 = vld [vmem:[%s5601_s0 + $0x150] sm:$0xff] }
  0x16   :  { %v3831_v5 = vld [vmem:[%s5602_s1 + $0x154] ss:$12 sps:$4 sm:$0xff]   ;;  %v79_v7 = vld [vmem:[%s5601_s0 + $0x188] sm:$0xff]  ;;  %v3850_v10 = vld [vmem:[%s5602_s1 + $0x278] ss:$12 sps:$4 sm:$0xff]  }
  0x17   :  { %1214 = vmatpush1.bf16.msra.mxu0 %v3801_v22  ;;  %3369 = vmatpush3.bf16.msra.mxu1 %v3802_v23  ;;  %v87_v8 = vld [vmem:[%s5601_s0 + $0x1c8] sm:$0xff]  ;;  %v94_v9 = vld [vmem:[%s5601_s0 + $0x200] sm:$0xff]  ;;  %v4430_v12 = vpack.c.bf16 %v79_v7, %v72_v6  ;;  %v3833_v13 = vld [vmem:[%s5602_s1 + $0x150] ss:$12 sps:$4 sm:$0xff]  }
  0x18   :  { %1215 = vmatprep.subr.bf16.mxu0 %v3803_v24  ;;  %3370 = vmatprep.subr.bf16.mxu1 %v3805_v25  ;;  %v3851_v11 = vld [vmem:[%s5602_s1 + $0x1b8] ss:$12 sps:$4 sm:$0xff]   ;;  %v4438_v15 = vpack.c.bf16 %v94_v9, %v87_v8  ;;  %v3855_v16 = vld [vmem:[%s5602_s1 + $0x290] ss:$12 sps:$4 sm:$0xff]   ;;  %v3836_v18 = vld [vmem:[%s5602_s1 + $0x168] ss:$12 sps:$4 sm:$0xff]  }
  0x19   :  { %v3834_v14 = vld [vmem:[%s5602_s1 + $0x16c] ss:$12 sps:$4 sm:$0xff]   ;;  %v3856_v17 = vld [vmem:[%s5602_s1 + $0x1d0] ss:$12 sps:$4 sm:$0xff]   ;;  %v86_v20 = vld [vmem:[%s5601_s0 + $0x1c0] sm:$0xff] }
  0x1a   :  { %v3839_v19 = vld [vmem:[%s5602_s1 + $0x184] ss:$12 sps:$4 sm:$0xff]   ;;  %v93_v21 = vld [vmem:[%s5601_s0 + $0x1f8] sm:$0xff]  ;;  %v3860_v24 = vld [vmem:[%s5602_s1 + $0x2a8] ss:$12 sps:$4 sm:$0xff]  }
  0x1b   :  { %1216 = vmatpush1.bf16.msra.mxu0 %v3806_v26  ;;  %3371 = vmatpush3.bf16.msra.mxu1 %v3807_v27  ;;  %v101_v22 = vld [vmem:[%s5601_s0 + $0x238] sm:$0xff]  ;;  %v108_v23 = vld [vmem:[%s5601_s0 + $0x270] sm:$0xff]  ;;  %v3837_v26 = vld [vmem:[%s5602_s1 + $0x180] ss:$12 sps:$4 sm:$0xff]   ;;  %v4475_v27 = vpack.c.bf16 %v93_v21, %v86_v20 }
  0x1c   :  { %1217 = vmatprep.subr.bf16.mxu0 %v3808_v28  ;;  %3372 = vmatprep.subr.bf16.mxu1 %v3810_v29  ;;  %v3861_v25 = vld [vmem:[%s5602_s1 + $0x1e8] ss:$12 sps:$4 sm:$0xff]   ;;  %v3865_v29 = vld [vmem:[%s5602_s1 + $0x2c0] ss:$12 sps:$4 sm:$0xff]   ;;  %v3842_v32 = vld [vmem:[%s5602_s1 + $0x198] ss:$12 sps:$4 sm:$0xff]  }
  0x1d   :  { %v3844_v28 = vld [vmem:[%s5602_s1 + $0x19c] ss:$12 sps:$4 sm:$0xff]   ;;  %v3866_v31 = vld [vmem:[%s5602_s1 + $0x200] ss:$12 sps:$4 sm:$0xff]   ;;  %v100_v34 = vld [vmem:[%s5601_s0 + $0x230] sm:$0xff] }
  0x1e   :  { %v115_v36 = vld [vmem:[%s5601_s0 + $0x2a8] sm:$0xff]  ;;  %v122_v37 = vld [vmem:[%s5601_s0 + $0x2e0] sm:$0xff]  ;;  %v121_v49 = vld [vmem:[%s5601_s0 + $0x2d8] sm:$0xff] }
  0x1f   :  { %1218 = vmatpush1.bf16.msra.mxu0 %v3811_v30  ;;  %3373 = vmatpush3.bf16.msra.mxu1 %v3812_v33  ;;  %v4483_v30 = vpack.c.bf16 %v108_v23, %v101_v22  ;;  %v3849_v33 = vld [vmem:[%s5602_s1 + $0x1b4] ss:$12 sps:$4 sm:$0xff]   ;;  %v3870_v38 = vld [vmem:[%s5602_s1 + $0x2d8] ss:$12 sps:$4 sm:$0xff]   ;;  %v135_v59 = vld [vmem:[%s5601_s0 + $0x348] sm:$0xff] }
  0x20   :  { %1219 = vmatprep.subr.bf16.mxu0 %v3813_v35  ;;  %3422 = vmatprep.subr.bf16.mxu1 %v3840_v60  ;;  %v107_v35 = vld [vmem:[%s5601_s0 + $0x268] sm:$0xff]  ;;  %v3871_v39 = vld [vmem:[%s5602_s1 + $0x218] ss:$12 sps:$4 sm:$0xff]   ;;  %v3869_v57 = vld [vmem:[%s5602_s1 + $0x214] ss:$12 sps:$4 sm:$0xff]  }
  0x21   :  { %v3852_v46 = vld [vmem:[%s5602_s1 + $0x1c8] ss:$12 sps:$4 sm:$0xff]   ;;  %v3859_v47 = vld [vmem:[%s5602_s1 + $0x1e4] ss:$12 sps:$4 sm:$0xff]   ;;  %v33_v60 = vld [vmem:[%s5601_s0 + $0x18] sm:$0xff] }
  0x22   :  { %1688 = vmatmul.mubr.bf16.vlgmr.msra.gmra.mrb[0].mxu1 %v4322_v40  ;;  %v114_v48 = vld [vmem:[%s5601_s0 + $0x2a0] sm:$0xff]  ;;  %v128_v58 = vld [vmem:[%s5601_s0 + $0x310] sm:$0xff]  ;;  %v47_v6 = vld [vmem:[%s5601_s0 + $0x88] sm:$0xff] }
  0x23   :  { %1220 = vmatpush1.bf16.msra.mxu0 %v3815_v41  ;;  %1695 = vmatprep.mubr.bf16.mxu1 %v4330_v43  ;;  %v4519_v41 = vpack.c.bf16 %v107_v35, %v100_v34  ;;  %v3862_v56 = vld [vmem:[%s5602_s1 + $0x1f8] ss:$12 sps:$4 sm:$0xff]   ;;  %v3904_v7 = vld [vmem:[%s5602_s1 + $0x3c8] ss:$12 sps:$4 sm:$0xff]   ;;  %v3877_v9 = vld [vmem:[%s5602_s1 + $0x240] ss:$12 sps:$4 sm:$0xff]  }
  0x24   :  { %1221 = vmatprep.subr.bf16.mxu0 %v3816_v42  ;;  %3423 = vmatpush3.bf16.msra.mxu1 %v3841_v61  ;;  %v3854_v42 = vld [vmem:[%s5602_s1 + $0x1cc] ss:$12 sps:$4 sm:$0xff]   ;;  %v40_v61 = vld [vmem:[%s5601_s0 + $0x50] sm:$0xff]  ;;  %v54_v8 = vld [vmem:[%s5601_s0 + $0xc0] sm:$0xff] }
  0x25   :  { %3424 = vmatprep.subr.bf16.mxu1 %v3845_v2  ;;  %v3872_v2 = vld [vmem:[%s5602_s1 + $0x228] ss:$12 sps:$4 sm:$0xff]   ;;  %v3910_v21 = vld [vmem:[%s5602_s1 + $0x320] ss:$12 sps:$4 sm:$0xff]   ;;  %v3914_v22 = vld [vmem:[%s5602_s1 + $0x3f8] ss:$12 sps:$4 sm:$0xff]  }
  0x26   :  { %v68_v20 = vld [vmem:[%s5601_s0 + $0x130] sm:$0xff]  ;;  %v82_v34 = vld [vmem:[%s5601_s0 + $0x1a0] sm:$0xff] }
  0x27   :  { %1222 = vmatpush1.bf16.msra.mxu0 %v3818_v44  ;;  %v4527_v44 = vpack.c.bf16 %v122_v37, %v115_v36  ;;  %v3883_v23 = vld [vmem:[%s5602_s1 + $0x270] ss:$12 sps:$4 sm:$0xff]   ;;  %v3924_v36 = vld [vmem:[%s5602_s1 + $0x428] ss:$12 sps:$4 sm:$0xff]   ;;  %v3889_v37 = vld [vmem:[%s5602_s1 + $0x2a0] ss:$12 sps:$4 sm:$0xff]  }
  0x28   :  { %1223 = vmatprep.subr.bf16.mxu0 %v3819_v45  ;;  %3425 = vmatpush3.bf16.msra.mxu1 %v3846_v4  ;;  %v3876_v45 = vld [vmem:[%s5602_s1 + $0x230] ss:$12 sps:$4 sm:$0xff]  }
  0x29   :  { %3426 = vmatprep.subr.bf16.mxu1 %v3850_v10  ;;  %v32_v4 = vld [vmem:[%s5601_s0 + $0x10] sm:$0xff] }
  0x2a   :  { %1696 = vmatmul.mubr.bf16.gmra.mrb[4].mxu1 %v4352_v50  ;;  %v3920_v35 = vld [vmem:[%s5602_s1 + $0x350] ss:$12 sps:$4 sm:$0xff]  }
  0x2b   :  { %1224 = vmatpush1.bf16.msra.mxu0 %v3821_v51  ;;  %1703 = vmatprep.mubr.bf16.mxu1 %v4360_v53  ;;  %v136_v51 = vld [vmem:[%s5601_s0 + $0x350] sm:$0xff] }
  0x2c   :  { %1225 = vmatprep.subr.bf16.mxu0 %v3822_v52  ;;  %3427 = vmatpush3.bf16.msra.mxu1 %v3851_v11  ;;  %v3857_v52 = vld [vmem:[%s5602_s1 + $0x1e0] ss:$12 sps:$4 sm:$0xff]   ;;  %v3882_v11 = vld [vmem:[%s5602_s1 + $0x25c] ss:$12 sps:$4 sm:$0xff]  }
  0x2d   :  { %3428 = vmatprep.subr.bf16.mxu1 %v3855_v16  ;;  %v3885_v16 = vld [vmem:[%s5602_s1 + $0x274] ss:$12 sps:$4 sm:$0xff]  }
  0x2f   :  { %1226 = vmatpush1.bf16.msra.mxu0 %v3824_v54  ;;  %v3864_v54 = vld [vmem:[%s5602_s1 + $0x1fc] ss:$12 sps:$4 sm:$0xff]  }
  0x30   :  { %1227 = vmatprep.subr.bf16.mxu0 %v3825_v55  ;;  %3429 = vmatpush3.bf16.msra.mxu1 %v3856_v17  ;;  %v46_v17 = vld [vmem:[%s5601_s0 + $0x80] sm:$0xff] }
  0x31   :  { %3430 = vmatprep.subr.bf16.mxu1 %v3860_v24 }
  0x32   :  { %1704 = vmatmul.mubr.bf16.gmra.mrb[8].mxu1 %v4388_v62 }
  0x33   :  { %1228 = vmatpush1.bf16.msra.mxu0 %v3827_v63  ;;  %1711 = vmatprep.mubr.bf16.mxu1 %v4396_v1  ;;  %v4589_v63 = vpack.c.bf16 %v135_v59, %v128_v58  ;;  %v3903_v58 = vld [vmem:[%s5602_s1 + $0x304] ss:$12 sps:$4 sm:$0xff]  }
  0x34   :  { %1229 = vmatprep.subr.bf16.mxu0 %v3828_v0  ;;  %3431 = vmatpush3.bf16.msra.mxu1 %v3861_v25  ;;  %v3874_v0 = vld [vmem:[%s5602_s1 + $0x22c] ss:$12 sps:$4 sm:$0xff]   ;;  %v88_v59 = vld [vmem:[%s5601_s0 + $0x1d0] sm:$0xff] }
  0x35   :  { %3432 = vmatprep.subr.bf16.mxu1 %v3865_v29  ;;  %v3888_v25 = vld [vmem:[%s5602_s1 + $0x28c] ss:$12 sps:$4 sm:$0xff]   ;;  %v3919_v29 = vld [vmem:[%s5602_s1 + $0x410] ss:$12 sps:$4 sm:$0xff]  }
  0x37   :  { %1230 = vmatpush1.bf16.msra.mxu0 %v3830_v3  ;;  %v3879_v3 = vld [vmem:[%s5602_s1 + $0x244] ss:$12 sps:$4 sm:$0xff]  }
  0x38   :  { %1231 = vmatprep.subr.bf16.mxu0 %v3831_v5  ;;  %3433 = vmatpush3.bf16.msra.mxu1 %v3866_v31  ;;  %v39_v5 = vld [vmem:[%s5601_s0 + $0x48] sm:$0xff]  ;;  %v60_v31 = vld [vmem:[%s5601_s0 + $0xf0] sm:$0xff] }
  0x39   :  { %3434 = vmatprep.subr.bf16.mxu1 %v3870_v38  ;;  %v4624_v10 = vpack.c.bf16 %v39_v5, %v32_v4  ;;  %v3906_v4 = vld [vmem:[%s5602_s1 + $0x318] ss:$12 sps:$4 sm:$0xff]   ;;  %v3913_v5 = vld [vmem:[%s5602_s1 + $0x334] ss:$12 sps:$4 sm:$0xff]  }
  0x3a   :  { %1712 = vmatmul.mubr.bf16.gmra.mrb[12].mxu1 %v4430_v12 }
  0x3b   :  { %1232 = vmatpush1.bf16.msra.mxu0 %v3833_v13  ;;  %1719 = vmatprep.mubr.bf16.mxu1 %v4438_v15  ;;  %v4632_v13 = vpack.c.bf16 %v54_v8, %v47_v6  ;;  %v102_v6 = vld [vmem:[%s5601_s0 + $0x240] sm:$0xff]  ;;  %v117_v8 = vld [vmem:[%s5601_s0 + $0x2b8] sm:$0xff] }
  0x3c   :  { %1233 = vmatprep.subr.bf16.mxu0 %v3834_v14  ;;  %3435 = vmatpush3.bf16.msra.mxu1 %v3871_v39  ;;  %v3905_v14 = vld [vmem:[%s5602_s1 + $0x308] ss:$12 sps:$4 sm:$0xff]  }
  0x3d   :  { %v3894_v39 = vld [vmem:[%s5602_s1 + $0x2bc] ss:$12 sps:$4 sm:$0xff]  }
  0x3f   :  { %1234 = vmatpush1.bf16.msra.mxu0 %v3836_v18  ;;  %v53_v18 = vld [vmem:[%s5601_s0 + $0xb8] sm:$0xff] }
  0x40   :  { %1316 = vmatprep.subr.bf16.mxu0 %v3839_v19  ;;  %v61_v19 = vld [vmem:[%s5601_s0 + $0xf8] sm:$0xff]  ;;  %v4668_v24 = vpack.c.bf16 %v53_v18, %v46_v17  ;;  %v123_v17 = vld [vmem:[%s5601_s0 + $0x2e8] sm:$0xff] }
  0x41   :  { %v131_v18 = vld [vmem:[%s5601_s0 + $0x328] sm:$0xff] }
  0x42   :  { %1236 = vmatmul.mubr.bf16.vlgmr.msra.gmra.mrb[0].mxu0 %v4322_v40  ;;  %1720 = vmatmul.mubr.bf16.gmra.mrb[16].mxu1 %v4475_v27  ;;  %v3847_v40 = vld [vmem:[%s5602_s1 + $0x1b0] ss:$12 sps:$4 sm:$0xff]  }
  0x43   :  { %1317 = vmatpush1.bf16.msra.mxu0 %v3837_v26  ;;  %1245 = vmatprep.mubr.bf16.mxu0 %v4330_v43  ;;  %v3875_v43 = vld [vmem:[%s5602_s1 + $0x2f0] ss:$12 sps:$4 sm:$0xff]   ;;  %v3886_v26 = vld [vmem:[%s5602_s1 + $0x288] ss:$12 sps:$4 sm:$0xff]  }
  0x44   :  { %1318 = vmatprep.subr.bf16.mxu0 %v3844_v28  ;;  %1727 = vmatprep.mubr.bf16.mxu1 %v4483_v30  ;;  %v3915_v28 = vld [vmem:[%s5602_s1 + $0x338] ss:$12 sps:$4 sm:$0xff]  }
  0x45   :  { %3436 = vmatprep.subr.bf16.mxu1 %v3875_v43  ;;  %v3929_v43 = vld [vmem:[%s5602_s1 + $0x440] ss:$12 sps:$4 sm:$0xff]  }
  0x46   :  { %3437 = vmatpush3.bf16.msra.mxu1 %v3876_v45  ;;  %v74_v45 = vld [vmem:[%s5601_s0 + $0x160] sm:$0xff] }
  0x47   :  { %1319 = vmatpush1.bf16.msra.mxu0 %v3842_v32  ;;  %3486 = vmatprep.subr.bf16.mxu1 %v3904_v7  ;;  %v67_v32 = vld [vmem:[%s5601_s0 + $0x128] sm:$0xff]  ;;  %v109_v7 = vld [vmem:[%s5601_s0 + $0x278] sm:$0xff] }
  0x48   :  { %1320 = vmatprep.subr.bf16.mxu0 %v3849_v33  ;;  %v75_v33 = vld [vmem:[%s5601_s0 + $0x168] sm:$0xff]  ;;  %v4712_v38 = vpack.c.bf16 %v67_v32, %v60_v31  ;;  %v42_v32 = vld [vmem:[%s5601_s0 + $0x60] sm:$0xff] }
  0x49   :  { %v35_v31 = vld [vmem:[%s5601_s0 + $0x28] sm:$0xff] }
  0x4a   :  { %1246 = vmatmul.mubr.bf16.gmra.mrb[4].mxu0 %v4352_v50  ;;  %1728 = vmatmul.mubr.bf16.gmra.mrb[20].mxu1 %v4519_v41  ;;  %v129_v50 = vld [vmem:[%s5601_s0 + $0x318] sm:$0xff] }
  0x4b   :  { %1321 = vmatpush1.bf16.msra.mxu0 %v3847_v40  ;;  %1255 = vmatprep.mubr.bf16.mxu0 %v4360_v53  ;;  %v4557_v53 = vpack.c.bf16 %v121_v49, %v114_v48  ;;  %v4562_v55 = vpack.c.bf16 %v136_v51, %v129_v50  ;;  %v3892_v40 = vld [vmem:[%s5602_s1 + $0x2b8] ss:$12 sps:$4 sm:$0xff]   ;;  %v96_v48 = vld [vmem:[%s5601_s0 + $0x210] sm:$0xff]  ;;  %v3930_v49 = vld [vmem:[%s5602_s1 + $0x380] ss:$12 sps:$4 sm:$0xff]  }
  0x4c   :  { %1322 = vmatprep.subr.bf16.mxu0 %v3854_v42  ;;  %1735 = vmatprep.mubr.bf16.mxu1 %v4527_v44  ;;  %v3925_v42 = vld [vmem:[%s5602_s1 + $0x368] ss:$12 sps:$4 sm:$0xff]   ;;  %v3934_v50 = vld [vmem:[%s5602_s1 + $0x458] ss:$12 sps:$4 sm:$0xff]   ;;  %v3895_v51 = vld [vmem:[%s5602_s1 + $0x2d0] ss:$12 sps:$4 sm:$0xff]  }
  0x4f   :  { %1323 = vmatpush1.bf16.msra.mxu0 %v3852_v46  ;;  %v81_v46 = vld [vmem:[%s5601_s0 + $0x198] sm:$0xff] }
  0x50   :  { %1324 = vmatprep.subr.bf16.mxu0 %v3859_v47  ;;  %v89_v47 = vld [vmem:[%s5601_s0 + $0x1d8] sm:$0xff] }
  0x52   :  { %1256 = vmatmul.mubr.bf16.gmra.mrb[8].mxu0 %v4388_v62  ;;  %1736 = vmatmul.mubr.bf16.gmra.mrb[24].mxu1 %v4557_v53  ;;  %v3867_v62 = vld [vmem:[%s5602_s1 + $0x210] ss:$12 sps:$4 sm:$0xff]  }
  0x53   :  { %1325 = vmatpush1.bf16.msra.mxu0 %v3857_v52  ;;  %1265 = vmatprep.mubr.bf16.mxu0 %v4396_v1  ;;  %v4594_v1 = vpack.c.bf16 %v40_v61, %v33_v60  ;;  %v4756_v52 = vpack.c.bf16 %v81_v46, %v74_v45  ;;  %v95_v60 = vld [vmem:[%s5601_s0 + $0x208] sm:$0xff]  ;;  %v3949_v46 = vld [vmem:[%s5602_s1 + $0x3f4] ss:$12 sps:$4 sm:$0xff]  }
  0x54   :  { %1326 = vmatprep.subr.bf16.mxu0 %v3864_v54  ;;  %1743 = vmatprep.mubr.bf16.mxu1 %v4562_v55  ;;  %v4761_v54 = vpack.c.bf16 %v96_v48, %v89_v47  ;;  %v103_v61 = vld [vmem:[%s5601_s0 + $0x248] sm:$0xff]  ;;  %v48_v47 = vld [vmem:[%s5601_s0 + $0x90] sm:$0xff] }
  0x55   :  { %v55_v48 = vld [vmem:[%s5601_s0 + $0xc8] sm:$0xff] }
  0x57   :  { %1327 = vmatpush1.bf16.msra.mxu0 %v3862_v56  ;;  %v3939_v56 = vld [vmem:[%s5602_s1 + $0x470] ss:$12 sps:$4 sm:$0xff]  }
  0x58   :  { %1328 = vmatprep.subr.bf16.mxu0 %v3869_v57  ;;  %v3898_v57 = vld [vmem:[%s5602_s1 + $0x2e8] ss:$12 sps:$4 sm:$0xff]  }
  0x5a   :  { %1266 = vmatmul.mubr.bf16.gmra.mrb[12].mxu0 %v4430_v12  ;;  %1744 = vmatmul.mubr.bf16.gmra.mrb[28].mxu1 %v4589_v63  ;;  %v3880_v12 = vld [vmem:[%s5602_s1 + $0x258] ss:$12 sps:$4 sm:$0xff]  }
  0x5b   :  { %1329 = vmatpush1.bf16.msra.mxu0 %v3867_v62  ;;  %1275 = vmatprep.mubr.bf16.mxu0 %v4438_v15  ;;  %v3909_v15 = vld [vmem:[%s5602_s1 + $0x3e0] ss:$12 sps:$4 sm:$0xff]   ;;  %v3940_v62 = vld [vmem:[%s5602_s1 + $0x3b0] ss:$12 sps:$4 sm:$0xff]  }
  0x5c   :  { %1330 = vmatprep.subr.bf16.mxu0 %v3874_v0  ;;  %1784 = vmatprep.mubr.bf16.mxu1 %v4594_v1  ;;  %v3901_v0 = vld [vmem:[%s5602_s1 + $0x300] ss:$12 sps:$4 sm:$0xff]  }
  0x5f   :  { %1331 = vmatpush1.bf16.msra.mxu0 %v3872_v2  ;;  %v3908_v2 = vld [vmem:[%s5602_s1 + $0x31c] ss:$12 sps:$4 sm:$0xff]  }
  0x60   :  { %1332 = vmatprep.subr.bf16.mxu0 %v3879_v3 }
  0x62   :  { %1276 = vmatmul.mubr.bf16.gmra.mrb[16].mxu0 %v4475_v27  ;;  %1785 = vmatmul.mubr.bf16.vlgmr.msra.gmra.mrb[32].mxu1 %v4624_v10  ;;  %v4676_v27 = vpack.c.bf16 %v68_v20, %v61_v19  ;;  %v138_v19 = vld [vmem:[%s5601_s0 + $0x360] sm:$0xff] }
  0x63   :  { %1333 = vmatpush1.bf16.msra.mxu0 %v3877_v9  ;;  %1285 = vmatprep.mubr.bf16.mxu0 %v4483_v30  ;;  %v3891_v30 = vld [vmem:[%s5602_s1 + $0x2a4] ss:$12 sps:$4 sm:$0xff]   ;;  %v3921_v20 = vld [vmem:[%s5602_s1 + $0x360] ss:$12 sps:$4 sm:$0xff]  }
  0x64   :  { %1334 = vmatprep.subr.bf16.mxu0 %v3882_v11  ;;  %1792 = vmatprep.mubr.bf16.mxu1 %v4632_v13  ;;  %v124_v9 = vld [vmem:[%s5601_s0 + $0x2f0] sm:$0xff]  ;;  %v4829_v11 = vpack.c.bf16 %v109_v7, %v102_v6 }
  0x65   :  { %3487 = vmatpush3.bf16.msra.mxu1 %v3905_v14  ;;  %v3916_v14 = vld [vmem:[%s5602_s1 + $0x348] ss:$12 sps:$4 sm:$0xff]  }
  0x66   :  { %3488 = vmatprep.subr.bf16.mxu1 %v3909_v15  ;;  %v3923_v15 = vld [vmem:[%s5602_s1 + $0x364] ss:$12 sps:$4 sm:$0xff]  }
  0x67   :  { %1335 = vmatpush1.bf16.msra.mxu0 %v3880_v12  ;;  %v3918_v12 = vld [vmem:[%s5602_s1 + $0x34c] ss:$12 sps:$4 sm:$0xff]  }
  0x68   :  { %1336 = vmatprep.subr.bf16.mxu0 %v3885_v16  ;;  %v116_v16 = vld [vmem:[%s5601_s0 + $0x2b0] sm:$0xff] }
  0x69   :  { %3489 = vmatpush3.bf16.msra.mxu1 %v3910_v21  ;;  %v4861_v21 = vpack.c.bf16 %v123_v17, %v116_v16 }
  0x6a   :  { %1286 = vmatmul.mubr.bf16.gmra.mrb[20].mxu0 %v4519_v41  ;;  %3490 = vmatprep.subr.bf16.mxu1 %v3914_v22  ;;  %v4720_v41 = vpack.c.bf16 %v82_v34, %v75_v33  ;;  %v3928_v22 = vld [vmem:[%s5602_s1 + $0x37c] ss:$12 sps:$4 sm:$0xff]  }
  0x6b   :  { %1793 = vmatmul.mubr.bf16.gmra.mrb[36].mxu1 %v4668_v24  ;;  %1337 = vmatpush1.bf16.msra.mxu0 %v3883_v23  ;;  %v4866_v23 = vpack.c.bf16 %v138_v19, %v131_v18  ;;  %v3936_v34 = vld [vmem:[%s5602_s1 + $0x3a8] ss:$12 sps:$4 sm:$0xff]  }
  0x6c   :  { %1338 = vmatprep.subr.bf16.mxu0 %v3888_v25  ;;  %1295 = vmatprep.mubr.bf16.mxu0 %v4527_v44  ;;  %v3897_v44 = vld [vmem:[%s5602_s1 + $0x2d4] ss:$12 sps:$4 sm:$0xff]   ;;  %v3926_v25 = vld [vmem:[%s5602_s1 + $0x378] ss:$12 sps:$4 sm:$0xff]  }
  0x6d   :  { %1800 = vmatprep.mubr.bf16.mxu1 %v4676_v27  ;;  %3491 = vmatpush3.bf16.msra.mxu1 %v3915_v28  ;;  %v137_v28 = vld [vmem:[%s5601_s0 + $0x358] sm:$0xff] }
  0x6e   :  { %3492 = vmatprep.subr.bf16.mxu1 %v3919_v29  ;;  %v3931_v29 = vld [vmem:[%s5602_s1 + $0x390] ss:$12 sps:$4 sm:$0xff]  }
  0x6f   :  { %1339 = vmatpush1.bf16.msra.mxu0 %v3886_v26  ;;  %v3933_v26 = vld [vmem:[%s5602_s1 + $0x394] ss:$12 sps:$4 sm:$0xff]  }
  0x70   :  { %1340 = vmatprep.subr.bf16.mxu0 %v3891_v30  ;;  %v3938_v30 = vld [vmem:[%s5602_s1 + $0x3ac] ss:$12 sps:$4 sm:$0xff]  }
  0x71   :  { %3493 = vmatpush3.bf16.msra.mxu1 %v3920_v35  ;;  %v4904_v35 = vpack.c.bf16 %v42_v32, %v35_v31 }
  0x72   :  { %1296 = vmatmul.mubr.bf16.gmra.mrb[24].mxu0 %v4557_v53  ;;  %3494 = vmatprep.subr.bf16.mxu1 %v3924_v36  ;;  %v3900_v53 = vld [vmem:[%s5602_s1 + $0x2ec] ss:$12 sps:$4 sm:$0xff]   ;;  %v3943_v36 = vld [vmem:[%s5602_s1 + $0x3c4] ss:$12 sps:$4 sm:$0xff]  }
  0x73   :  { %1801 = vmatmul.mubr.bf16.gmra.mrb[40].mxu1 %v4712_v38  ;;  %1341 = vmatpush1.bf16.msra.mxu0 %v3889_v37  ;;  %v34_v37 = vld [vmem:[%s5601_s0 + $0x20] sm:$0xff] }
  0x74   :  { %1342 = vmatprep.subr.bf16.mxu0 %v3894_v39  ;;  %1305 = vmatprep.mubr.bf16.mxu0 %v4562_v55  ;;  %v3935_v55 = vld [vmem:[%s5602_s1 + $0x398] ss:$12 sps:$4 sm:$0xff]  }
  0x75   :  { %1808 = vmatprep.mubr.bf16.mxu1 %v4720_v41  ;;  %3495 = vmatpush3.bf16.msra.mxu1 %v3925_v42  ;;  %v49_v39 = vld [vmem:[%s5601_s0 + $0x98] sm:$0xff] }
  0x76   :  { %3496 = vmatprep.subr.bf16.mxu1 %v3929_v43  ;;  %v3946_v42 = vld [vmem:[%s5602_s1 + $0x3dc] ss:$12 sps:$4 sm:$0xff]  }
  0x77   :  { %1343 = vmatpush1.bf16.msra.mxu0 %v3892_v40  ;;  %v56_v40 = vld [vmem:[%s5601_s0 + $0xd0] sm:$0xff] }
  0x78   :  { %1344 = vmatprep.subr.bf16.mxu0 %v3897_v44  ;;  %v3944_v44 = vld [vmem:[%s5602_s1 + $0x3d8] ss:$12 sps:$4 sm:$0xff]   ;;  %v4936_v45 = vpack.c.bf16 %v56_v40, %v49_v39 }
  0x79   :  { %3497 = vmatpush3.bf16.msra.mxu1 %v3930_v49  ;;  %v63_v49 = vld [vmem:[%s5601_s0 + $0x108] sm:$0xff] }
  0x7a   :  { %1306 = vmatmul.mubr.bf16.gmra.mrb[28].mxu0 %v4589_v63  ;;  %3498 = vmatprep.subr.bf16.mxu1 %v3934_v50  ;;  %v110_v63 = vld [vmem:[%s5601_s0 + $0x280] sm:$0xff] }
  0x7b   :  { %1809 = vmatmul.mubr.bf16.gmra.mrb[44].mxu1 %v4756_v52  ;;  %1345 = vmatpush1.bf16.msra.mxu0 %v3895_v51  ;;  %v4802_v3 = vpack.c.bf16 %v110_v63, %v103_v61  ;;  %v70_v50 = vld [vmem:[%s5601_s0 + $0x140] sm:$0xff]  ;;  %v3947_v51 = vld [vmem:[%s5602_s1 + $0x3f0] ss:$12 sps:$4 sm:$0xff]  }
  0x7c   :  { %1346 = vmatprep.subr.bf16.mxu0 %v3900_v53  ;;  %1348 = vmatprep.mubr.bf16.mxu0 %v4594_v1  ;;  %v4797_v1 = vpack.c.bf16 %v95_v60, %v88_v59  ;;  %v4963_v53 = vpack.c.bf16 %v55_v48, %v48_v47  ;;  %v77_v59 = vld [vmem:[%s5601_s0 + $0x178] sm:$0xff]  ;;  %v84_v60 = vld [vmem:[%s5601_s0 + $0x1b0] sm:$0xff]  ;;  %v3953_v61 = vld [vmem:[%s5602_s1 + $0x420] ss:$12 sps:$4 sm:$0xff]  }
  0x7d   :  { %1816 = vmatprep.mubr.bf16.mxu1 %v4761_v54  ;;  %3499 = vmatpush3.bf16.msra.mxu1 %v3935_v55  ;;  %v4968_v55 = vpack.c.bf16 %v70_v50, %v63_v49 }
  0x7e   :  { %3500 = vmatprep.subr.bf16.mxu1 %v3939_v56  ;;  %v3955_v56 = vld [vmem:[%s5602_s1 + $0x424] ss:$12 sps:$4 sm:$0xff]  }
  0x7f   :  { %1347 = vmatpush1.bf16.msra.mxu0 %v3898_v57  ;;  %v62_v57 = vld [vmem:[%s5601_s0 + $0x100] sm:$0xff] }
  0x80   :  { %1429 = vmatprep.subr.bf16.mxu0 %v3903_v58  ;;  %v69_v58 = vld [vmem:[%s5601_s0 + $0x138] sm:$0xff] }
  0x81   :  { %3501 = vmatpush3.bf16.msra.mxu1 %v3940_v62  ;;  %v3958_v62 = vld [vmem:[%s5602_s1 + $0x43c] ss:$12 sps:$4 sm:$0xff]   ;;  %v160_v63 = vpack.c.bf16 %v69_v58, %v62_v57 }
  0x82   :  { %1349 = vmatmul.mubr.bf16.vlgmr.msra.gmra.mrb[0].mxu0 %v4624_v10  ;;  %v3911_v10 = vld [vmem:[%s5602_s1 + $0x330] ss:$12 sps:$4 sm:$0xff]  }
  0x83   :  { %1817 = vmatmul.mubr.bf16.gmra.mrb[48].mxu1 %v4797_v1  ;;  %1430 = vmatpush1.bf16.msra.mxu0 %v3901_v0  ;;  %v168_v0 = vpack.c.bf16 %v84_v60, %v77_v59 }
  0x84   :  { %1431 = vmatprep.subr.bf16.mxu0 %v3908_v2  ;;  %1358 = vmatprep.mubr.bf16.mxu0 %v4632_v13  ;;  %v4834_v13 = vpack.c.bf16 %v124_v9, %v117_v8 }
  0x85   :  { %1824 = vmatprep.mubr.bf16.mxu1 %v4802_v3 }
  0x87   :  { %1432 = vmatpush1.bf16.msra.mxu0 %v3906_v4 }
  0x88   :  { %1433 = vmatprep.subr.bf16.mxu0 %v3913_v5 }
  0x8a   :  { %1359 = vmatmul.mubr.bf16.gmra.mrb[4].mxu0 %v4668_v24  ;;  %v3968_v24 = vld [vmem:[%s5602_s1 + $0x488] ss:$12 sps:$4 sm:$0xff]  }
  0x8b   :  { %1825 = vmatmul.mubr.bf16.gmra.mrb[52].mxu1 %v4829_v11  ;;  %1434 = vmatpush1.bf16.msra.mxu0 %v3911_v10 }
  0x8c   :  { %1435 = vmatprep.subr.bf16.mxu0 %v3918_v12  ;;  %1368 = vmatprep.mubr.bf16.mxu0 %v4676_v27  ;;  %v130_v27 = vld [vmem:[%s5601_s0 + $0x320] sm:$0xff] }
  0x8d   :  { %1832 = vmatprep.mubr.bf16.mxu1 %v4834_v13  ;;  %3623 = vmatprep.subr.bf16.mxu1 %v3968_v24  ;;  %v4899_v33 = vpack.c.bf16 %v137_v28, %v130_v27 }
  0x8f   :  { %1436 = vmatpush1.bf16.msra.mxu0 %v3916_v14 }
  0x90   :  { %1437 = vmatprep.subr.bf16.mxu0 %v3923_v15 }
  0x92   :  { %1369 = vmatmul.mubr.bf16.gmra.mrb[8].mxu0 %v4712_v38  ;;  %v41_v38 = vld [vmem:[%s5601_s0 + $0x58] sm:$0xff] }
  0x93   :  { %1833 = vmatmul.mubr.bf16.gmra.mrb[56].mxu1 %v4861_v21  ;;  %1438 = vmatpush1.bf16.msra.mxu0 %v3921_v20  ;;  %v4931_v43 = vpack.c.bf16 %v41_v38, %v34_v37 }
  0x94   :  { %1439 = vmatprep.subr.bf16.mxu0 %v3928_v22  ;;  %1378 = vmatprep.mubr.bf16.mxu0 %v4720_v41  ;;  %v3941_v41 = vld [vmem:[%s5602_s1 + $0x3c0] ss:$12 sps:$4 sm:$0xff]  }
  0x95   :  { %1840 = vmatprep.mubr.bf16.mxu1 %v4866_v23 }
  0x97   :  { %1440 = vmatpush1.bf16.msra.mxu0 %v3926_v25 }
  0x98   :  { %1441 = vmatprep.subr.bf16.mxu0 %v3933_v26 }
  0x9a   :  { %1379 = vmatmul.mubr.bf16.gmra.mrb[12].mxu0 %v4756_v52  ;;  %v3952_v52 = vld [vmem:[%s5602_s1 + $0x40c] ss:$12 sps:$4 sm:$0xff]  }
  0x9b   :  { %1841 = vmatmul.mubr.bf16.gmra.mrb[60].mxu1 %v4899_v33  ;;  %1442 = vmatpush1.bf16.msra.mxu0 %v3931_v29 }
  0x9c   :  { %1443 = vmatprep.subr.bf16.mxu0 %v3938_v30  ;;  %1388 = vmatprep.mubr.bf16.mxu0 %v4761_v54  ;;  %v3950_v54 = vld [vmem:[%s5602_s1 + $0x408] ss:$12 sps:$4 sm:$0xff]  }
  0x9d   :  { %1881 = vmatprep.mubr.bf16.mxu1 %v4904_v35 }
  0x9f   :  { %1444 = vmatpush1.bf16.msra.mxu0 %v3936_v34 }
  0xa0   :  { %1445 = vmatprep.subr.bf16.mxu0 %v3943_v36 }
  0xa2   :  { %1389 = vmatmul.mubr.bf16.gmra.mrb[16].mxu0 %v4797_v1 }
  0xa3   :  { %1882 = vmatmul.mubr.bf16.vlgmr.msra.gmra.mrb[64].mxu1 %v4931_v43  ;;  %1446 = vmatpush1.bf16.msra.mxu0 %v3941_v41 }
  0xa4   :  { %1447 = vmatprep.subr.bf16.mxu0 %v3946_v42  ;;  %1398 = vmatprep.mubr.bf16.mxu0 %v4802_v3 }
  0xa5   :  { %1889 = vmatprep.mubr.bf16.mxu1 %v4936_v45  ;;  %3624 = vmatpush3.bf16.msra.mxu1 %v3968_v24 }
  0xa7   :  { %1448 = vmatpush1.bf16.msra.mxu0 %v3944_v44 }
  0xa8   :  { %1449 = vmatprep.subr.bf16.mxu0 %v3949_v46 }
  0xaa   :  { %1399 = vmatmul.mubr.bf16.gmra.mrb[20].mxu0 %v4829_v11 }
  0xab   :  { %1890 = vmatmul.mubr.bf16.gmra.mrb[68].mxu1 %v4963_v53  ;;  %1450 = vmatpush1.bf16.msra.mxu0 %v3947_v51 }
  0xac   :  { %1451 = vmatprep.subr.bf16.mxu0 %v3952_v52  ;;  %1408 = vmatprep.mubr.bf16.mxu0 %v4834_v13 }
  0xad   :  { %1897 = vmatprep.mubr.bf16.mxu1 %v4968_v55 }
  0xaf   :  { %1452 = vmatpush1.bf16.msra.mxu0 %v3950_v54 }
  0xb0   :  { %1453 = vmatprep.subr.bf16.mxu0 %v3955_v56 }
  0xb1   :  { %12 = vsyncpa [#allocation3], 0  ;;  %v3956_v1 = vld [vmem:[%s5602_s1 + $0x438] ss:$12 sps:$4 sm:$0xff]   ;;  %v3961_v2 = vld [vmem:[%s5602_s1 + $0x454] ss:$12 sps:$4 sm:$0xff]  }
  0xb2   :  { %1409 = vmatmul.mubr.bf16.gmra.mrb[24].mxu0 %v4861_v21  ;;  %v76_v3 = vld [vmem:[%s5601_s0 + $0x170] sm:$0xff]  ;;  %v83_v4 = vld [vmem:[%s5601_s0 + $0x1a8] sm:$0xff]  ;;  %v98_v6 = vld [vmem:[%s5601_s0 + $0x220] sm:$0xff]  ;;  %vm1178_vm0 = vcmask 130048  }
  0xb3   :  { %1898 = vmatmul.mubr.bf16.gmra.mrb[72].mxu1 %v160_v63  ;;  %1454 = vmatpush1.bf16.msra.mxu0 %v3953_v61  ;;  %v91_v5 = vld [vmem:[%s5601_s0 + $0x1e8] sm:$0xff]  ;;  %v3959_v7 = vld [vmem:[%s5602_s1 + $0x450] ss:$12 sps:$4 sm:$0xff]   ;;  %v167_v8 = vpack.c.bf16 %v83_v4, %v76_v3  ;;  %v90_v13 = vld [vmem:[%s5601_s0 + $0x1e0] sm:$0xff] }
  0xb4   :  { %1455 = vmatprep.subr.bf16.mxu0 %v3958_v62  ;;  %1418 = vmatprep.mubr.bf16.mxu0 %v4866_v23  ;;  %v3964_v9 = vld [vmem:[%s5602_s1 + $0x46c] ss:$12 sps:$4 sm:$0xff]   ;;  %v175_v10 = vpack.c.bf16 %v98_v6, %v91_v5  ;;  %v3962_v11 = vld [vmem:[%s5602_s1 + $0x468] ss:$12 sps:$4 sm:$0xff]   ;;  %v3967_v12 = vld [vmem:[%s5602_s1 + $0x484] ss:$12 sps:$4 sm:$0xff]  }
  0xb5   :  { %1905 = vmatprep.mubr.bf16.mxu1 %v168_v0  ;;  %v97_v14 = vld [vmem:[%s5601_s0 + $0x218] sm:$0xff]  ;;  %v112_v16 = vld [vmem:[%s5601_s0 + $0x290] sm:$0xff]  ;;  %v3965_v17 = vld [vmem:[%s5602_s1 + $0x480] ss:$12 sps:$4 sm:$0xff]  }
  0xb6   :  { %v105_v15 = vld [vmem:[%s5601_s0 + $0x258] sm:$0xff]  ;;  %v174_v18 = vpack.c.bf16 %v97_v14, %v90_v13  ;;  %v104_v20 = vld [vmem:[%s5601_s0 + $0x250] sm:$0xff]  ;;  %v111_v21 = vld [vmem:[%s5601_s0 + $0x288] sm:$0xff] }
  0xb7   :  { %1456 = vmatpush1.bf16.msra.mxu0 %v3956_v1  ;;  %v182_v19 = vpack.c.bf16 %v112_v16, %v105_v15  ;;  %v119_v22 = vld [vmem:[%s5601_s0 + $0x2c8] sm:$0xff]  ;;  %v126_v23 = vld [vmem:[%s5601_s0 + $0x300] sm:$0xff]  ;;  %v181_v24 = vpack.c.bf16 %v111_v21, %v104_v20  ;;  %v125_v27 = vld [vmem:[%s5601_s0 + $0x2f8] sm:$0xff]  ;;  %v4161_v1 = vmov 0  }
  0xb8   :  { %1457 = vmatprep.subr.bf16.mxu0 %v3961_v2  ;;  %v189_v25 = vpack.c.bf16 %v126_v23, %v119_v22  ;;  %v118_v26 = vld [vmem:[%s5601_s0 + $0x2c0] sm:$0xff]  ;;  %v133_v28 = vld [vmem:[%s5601_s0 + $0x338] sm:$0xff]  ;;  %v140_v29 = vld [vmem:[%s5601_s0 + $0x370] sm:$0xff] }
  0xb9   :  { %v188_v30 = vpack.c.bf16 %v125_v27, %v118_v26  ;;  %v196_v31 = vpack.c.bf16 %v140_v29, %v133_v28  ;;  %v132_v32 = vld [vmem:[%s5601_s0 + $0x330] sm:$0xff]  ;;  %v50_v38 = vld [vmem:[%s5601_s0 + $0xa0] sm:$0xff]  ;;  %v57_v39 = vld [vmem:[%s5601_s0 + $0xd8] sm:$0xff] }
  0xba   :  { %1419 = vmatmul.mubr.bf16.gmra.mrb[28].mxu0 %v4899_v33  ;;  %v139_v33 = vld [vmem:[%s5601_s0 + $0x368] sm:$0xff]  ;;  %v36_v34 = vld [vmem:[%s5601_s0 + $0x30] sm:$0xff]  ;;  %v155_v42 = vpack.c.bf16 %v57_v39, %v50_v38  ;;  %v78_v44 = vld [vmem:[%s5601_s0 + $0x180] sm:$0xff] }
  0xbb   :  { %1906 = vmatmul.mubr.bf16.gmra.mrb[76].mxu1 %v167_v8  ;;  %1458 = vmatpush1.bf16.msra.mxu0 %v3959_v7  ;;  %v195_v36 = vpack.c.bf16 %v139_v33, %v132_v32  ;;  %v64_v40 = vld [vmem:[%s5601_s0 + $0x110] sm:$0xff]  ;;  %v71_v41 = vld [vmem:[%s5601_s0 + $0x148] sm:$0xff]  ;;  %v106_v50 = vld [vmem:[%s5601_s0 + $0x260] sm:$0xff] }
  0xbc   :  { %1459 = vmatprep.subr.bf16.mxu0 %v3964_v9  ;;  %1461 = vmatprep.mubr.bf16.mxu0 %v4904_v35  ;;  %v43_v35 = vld [vmem:[%s5601_s0 + $0x68] sm:$0xff]  ;;  %v92_v46 = vld [vmem:[%s5601_s0 + $0x1f0] sm:$0xff]  ;;  %v113_v51 = vld [vmem:[%s5601_s0 + $0x298] sm:$0xff] }
  0xbd   :  { %1913 = vmatprep.mubr.bf16.mxu1 %v175_v10  ;;  %v148_v37 = vpack.c.bf16 %v43_v35, %v36_v34  ;;  %v99_v47 = vld [vmem:[%s5601_s0 + $0x228] sm:$0xff]  ;;  %v120_v52 = vld [vmem:[%s5601_s0 + $0x2d0] sm:$0xff]  ;;  %v5128_v54 = vpack.c.bf16 %v113_v51, %v106_v50  ;;  %v134_v56 = vld [vmem:[%s5601_s0 + $0x340] sm:$0xff] }
  0xbe   :  { %v5111_v49 = vpack.c.bf16 %v99_v47, %v92_v46  ;;  %v141_v57 = vld [vmem:[%s5601_s0 + $0x378] sm:$0xff]  ;;  %v5214_v51 = vld [vmem:[%s5603_s2] sm:$0x7] }
  0xbf   :  { %1460 = vmatpush1.bf16.msra.mxu0 %v3962_v11  ;;  %v5142_v59 = vpack.c.bf16 %v141_v57, %v134_v56 }
  0xc0   :  { %1542 = vmatprep.subr.bf16.mxu0 %v3967_v12 }
  0xc2   :  { %1462 = vmatmul.mubr.bf16.vlgmr.msra.gmra.mrb[0].mxu0 %v4931_v43  ;;  %v162_v43 = vpack.c.bf16 %v71_v41, %v64_v40  ;;  %v3971_v40 = vld [vmem:[%s5604_s3 + $0x4] ss:$8 sps:$4 sm:$0xff]   ;;  %v2069_v41 = vlaneseq }
  0xc3   :  { %1914 = vmatmul.mubr.bf16.gmra.mrb[80].mxu1 %v174_v18  ;;  %1543 = vmatpush1.bf16.msra.mxu0 %v3965_v17 }
  0xc4   :  { %1471 = vmatprep.mubr.bf16.mxu0 %v4936_v45  ;;  %1921 = vmatprep.mubr.bf16.mxu1 %v182_v19  ;;  %v85_v45 = vld [vmem:[%s5601_s0 + $0x1b8] sm:$0xff]  ;;  %v5197_v46 = vshrl.u32 %v2069_v41, 7 }
  0xc5   :  { %v169_v48 = vpack.c.bf16 %v85_v45, %v78_v44  ;;  %v3969_v44 = vld [vmem:[%s5604_s3] ss:$8 sps:$4 sm:$0xff]   ;;  %2516 = vmatprep.subr.bf16.mxu1 %v3971_v40 }
  0xc6   :  { %v2079_v50 = vsub.s32 2, %v5197_v46  ;;  %v3993_v40 = vld [vmem:[%s5604_s3 + $0x80] ss:$8 sps:$4 sm:$0xff]  }
  0xca   :  { %1472 = vmatmul.mubr.bf16.gmra.mrb[4].mxu0 %v4963_v53  ;;  %v127_v53 = vld [vmem:[%s5601_s0 + $0x308] sm:$0xff] }
  0xcb   :  { %1922 = vmatmul.mubr.bf16.gmra.mrb[84].mxu1 %v181_v24  ;;  %1481 = vmatprep.mubr.bf16.mxu0 %v4968_v55  ;;  %v5130_v55 = vpack.c.bf16 %v127_v53, %v120_v52  ;;  %v5217_v52 = vrot.slane %v5214_v51, %v2079_v50 }
  0xcc   :  { %1929 = vmatprep.mubr.bf16.mxu1 %v189_v25 }
  0xd2   :  { %1482 = vmatmul.mubr.bf16.gmra.mrb[8].mxu0 %v160_v63 }
  0xd3   :  { %1930 = vmatmul.mubr.bf16.gmra.mrb[88].mxu1 %v188_v30  ;;  %1491 = vmatprep.mubr.bf16.mxu0 %v168_v0 }
  0xd4   :  { %1937 = vmatprep.mubr.bf16.mxu1 %v196_v31 }
  0xda   :  { %1492 = vmatmul.mubr.bf16.gmra.mrb[12].mxu0 %v167_v8 }
  0xdb   :  { %1938 = vmatmul.mubr.bf16.gmra.mrb[92].mxu1 %v195_v36  ;;  %1501 = vmatprep.mubr.bf16.mxu0 %v175_v10 }
  0xdc   :  { %3625 = vmatprep.mubr.msk.bf16.mxu1 %vm1178_vm0, %v148_v37 }
  0xe2   :  { %1502 = vmatmul.mubr.bf16.gmra.mrb[16].mxu0 %v174_v18 }
  0xe3   :  { %3626 = vmatmul.mubr.msk.bf16.vlgmr.msra.gmra.mrb[96].mxu1 %vm1178_vm0, %v155_v42  ;;  %1511 = vmatprep.mubr.bf16.mxu0 %v182_v19 }
  0xe4   :  { %3629 = vmatprep.mubr.msk.bf16.mxu1 %vm1178_vm0, %v162_v43  ;;  %2517 = vmatpush1.bf16.msra.mxu1 %v3969_v44  ;;  %v3998_v44 = vld [vmem:[%s5604_s3 + $0x94] ss:$8 sps:$4 sm:$0xff]  }
  0xea   :  { %1512 = vmatmul.mubr.bf16.gmra.mrb[20].mxu0 %v181_v24 }
  0xeb   :  { %3630 = vmatmul.mubr.msk.bf16.gmra.mrb[100].mxu1 %vm1178_vm0, %v169_v48  ;;  %1521 = vmatprep.mubr.bf16.mxu0 %v189_v25 }
  0xec   :  { %3633 = vmatprep.mubr.msk.bf16.mxu1 %vm1178_vm0, %v5111_v49 }
  0xf2   :  { %1522 = vmatmul.mubr.bf16.gmra.mrb[24].mxu0 %v188_v30 }
  0xf3   :  { %3634 = vmatmul.mubr.msk.bf16.gmra.mrb[104].mxu1 %vm1178_vm0, %v5128_v54  ;;  %1531 = vmatprep.mubr.bf16.mxu0 %v196_v31 }
  0xf4   :  { %3637 = vmatprep.mubr.msk.bf16.mxu1 %vm1178_vm0, %v5130_v55 }
  0xf5   :  { %v3374_v58 = vpop.f32.mrb[0].mxu1 }
  0xf6   :  { %v3375_v60 = vpop.f32.mrb[1].mxu1 }
  0xf7   :  { %v5144_v61 = vadd.f32 %v3375_v60, %v3374_v58  ;;  %v3377_v62 = vpop.f32.mrb[2].mxu1  ;;  %v3975_v58 = vld [vmem:[%s5604_s3 + $0x20] ss:$8 sps:$4 sm:$0xff]  }
  0xf8   :  { %v3378_v63 = vpop.f32.mrb[3].mxu1 }
  0xf9   :  { %v5146_v0 = vadd.f32 %v3378_v63, %v3377_v62 }
  0xfa   :  { %1532 = vmatmul.mubr.bf16.gmra.mrb[28].mxu0 %v195_v36 }
  0xfb   :  { %3638 = vmatmul.mubr.msk.bf16.gmra.mrb[108].mxu1 %vm1178_vm0, %v5142_v59  ;;  %1574 = vmatprep.mubr.bf16.mxu0 %v4161_v1 }
  0xfd   :  { %v3380_v2 = vpop.f32.mrb[4].mxu1 }
  0xfe   :  { %v3381_v3 = vpop.f32.mrb[5].mxu1 }
  0xff   :  { %v5151_v4 = vadd.f32 %v3381_v3, %v3380_v2  ;;  %v3383_v5 = vpop.f32.mrb[6].mxu1  ;;  %v3980_v2 = vld [vmem:[%s5604_s3 + $0x34] ss:$8 sps:$4 sm:$0xff]  }
 0x100   :  { %v3384_v6 = vpop.f32.mrb[7].mxu1 }
 0x101   :  { %v5154_v7 = vadd.f32 %v3384_v6, %v3383_v5  ;;  %v3978_v5 = vld [vmem:[%s5604_s3 + $0x30] ss:$8 sps:$4 sm:$0xff]  }
 0x102   :  { %3277 = vmatmul.mubr.msk.bf16.vlgmr.msra.gmra.mrb[0].mxu0 %vm1178_vm0, %v148_v37 }
 0x103   :  { %1584 = vmatprep.mubr.bf16.mxu0 %v4161_v1 }
 0x105   :  { %v3386_v8 = vpop.f32.mrb[8].mxu1 }
 0x106   :  { %v3387_v9 = vpop.f32.mrb[9].mxu1 }
 0x107   :  { %v5157_v10 = vadd.f32 %v3387_v9, %v3386_v8  ;;  %v3389_v11 = vpop.f32.mrb[10].mxu1 }
 0x108   :  { %v3390_v12 = vpop.f32.mrb[11].mxu1 }
 0x109   :  { %v5160_v13 = vadd.f32 %v3390_v12, %v3389_v11  ;;  %v3981_v11 = vld [vmem:[%s5604_s3 + $0x40] ss:$8 sps:$4 sm:$0xff]  }
 0x10a   :  { %3278 = vmatmul.mubr.msk.bf16.gmra.mrb[4].mxu0 %vm1178_vm0, %v155_v42 }
 0x10b   :  { %1594 = vmatprep.mubr.bf16.mxu0 %v4161_v1 }
 0x10d   :  { %v3392_v14 = vpop.f32.mrb[12].mxu1 }
 0x10e   :  { %v3393_v15 = vpop.f32.mrb[13].mxu1 }
 0x10f   :  { %v5163_v16 = vadd.f32 %v3393_v15, %v3392_v14  ;;  %v3395_v17 = vpop.f32.mrb[14].mxu1  ;;  %v3986_v15 = vld [vmem:[%s5604_s3 + $0x54] ss:$8 sps:$4 sm:$0xff]  }
 0x110   :  { %v3396_v18 = vpop.f32.mrb[15].mxu1 }
 0x111   :  { %v5166_v19 = vadd.f32 %v3396_v18, %v3395_v17  ;;  %v3984_v18 = vld [vmem:[%s5604_s3 + $0x50] ss:$8 sps:$4 sm:$0xff]  }
 0x112   :  { %3279 = vmatmul.mubr.msk.bf16.gmra.mrb[8].mxu0 %vm1178_vm0, %v162_v43 }
 0x113   :  { %1604 = vmatprep.mubr.bf16.mxu0 %v4161_v1 }
 0x115   :  { %v3398_v20 = vpop.f32.mrb[16].mxu1 }
 0x116   :  { %v3399_v21 = vpop.f32.mrb[17].mxu1 }
 0x117   :  { %v5169_v22 = vadd.f32 %v3399_v21, %v3398_v20  ;;  %v3401_v23 = vpop.f32.mrb[18].mxu1 }
 0x118   :  { %v3402_v24 = vpop.f32.mrb[19].mxu1 }
 0x119   :  { %v5172_v25 = vadd.f32 %v3402_v24, %v3401_v23 }
 0x11a   :  { %3280 = vmatmul.mubr.msk.bf16.gmra.mrb[12].mxu0 %vm1178_vm0, %v169_v48  ;;  %v3972_v48 = vld [vmem:[%s5604_s3 + $0x10] ss:$8 sps:$4 sm:$0xff]  }
 0x11b   :  { %1614 = vmatprep.mubr.bf16.mxu0 %v4161_v1 }
 0x11d   :  { %v3404_v26 = vpop.f32.mrb[20].mxu1 }
 0x11e   :  { %v3405_v27 = vpop.f32.mrb[21].mxu1 }
 0x11f   :  { %v5175_v28 = vadd.f32 %v3405_v27, %v3404_v26  ;;  %v3407_v29 = vpop.f32.mrb[22].mxu1  ;;  %v3987_v26 = vld [vmem:[%s5604_s3 + $0x60] ss:$8 sps:$4 sm:$0xff]  }
 0x120   :  { %v3408_v30 = vpop.f32.mrb[23].mxu1 }
 0x121   :  { %v5179_v31 = vadd.f32 %v3408_v30, %v3407_v29  ;;  %v3992_v30 = vld [vmem:[%s5604_s3 + $0x74] ss:$8 sps:$4 sm:$0xff]  }
 0x122   :  { %3281 = vmatmul.mubr.msk.bf16.gmra.mrb[16].mxu0 %vm1178_vm0, %v5111_v49  ;;  %v3974_v49 = vld [vmem:[%s5604_s3 + $0x14] ss:$8 sps:$4 sm:$0xff]  }
 0x123   :  { %1624 = vmatprep.mubr.bf16.mxu0 %v4161_v1  ;;  %2518 = vmatprep.subr.bf16.mxu1 %v3974_v49 }
 0x124   :  { %2519 = vmatpush1.bf16.msra.mxu1 %v3972_v48  ;;  %v3996_v48 = vld [vmem:[%s5604_s3 + $0x90] ss:$8 sps:$4 sm:$0xff]  }
 0x125   :  { %v3410_v32 = vpop.f32.mrb[24].mxu1 }
 0x126   :  { %v3411_v33 = vpop.f32.mrb[25].mxu1 }
 0x127   :  { %v5182_v34 = vadd.f32 %v3411_v33, %v3410_v32  ;;  %v3413_v35 = vpop.f32.mrb[26].mxu1  ;;  %v3990_v33 = vld [vmem:[%s5604_s3 + $0x70] ss:$8 sps:$4 sm:$0xff]  }
 0x128   :  { %v3414_v36 = vpop.f32.mrb[27].mxu1 }
 0x129   :  { %v5186_v37 = vadd.f32 %v3414_v36, %v3413_v35 }
 0x12a   :  { %3282 = vmatmul.mubr.msk.bf16.gmra.mrb[20].mxu0 %vm1178_vm0, %v5128_v54 }
 0x12b   :  { %1634 = vmatprep.mubr.bf16.mxu0 %v4161_v1 }
 0x12d   :  { %v3416_v38 = vpop.f32.mrb[28].mxu1 }
 0x12e   :  { %v3417_v39 = vpop.f32.mrb[29].mxu1 }
 0x12f   :  { %v5192_v42 = vadd.f32 %v3417_v39, %v3416_v38  ;;  %v3419_v43 = vpop.f32.mrb[30].mxu1 }
 0x130   :  { %v3420_v45 = vpop.f32.mrb[31].mxu1 }
 0x131   :  { %v5201_v47 = vadd.f32 %v3420_v45, %v3419_v43 }
 0x132   :  { %3283 = vmatmul.mubr.msk.bf16.gmra.mrb[24].mxu0 %vm1178_vm0, %v5130_v55  ;;  %v3977_v55 = vld [vmem:[%s5604_s3 + $0x24] ss:$8 sps:$4 sm:$0xff]  }
 0x133   :  { %1644 = vmatprep.mubr.bf16.mxu0 %v4161_v1  ;;  %2520 = vmatprep.subr.bf16.mxu1 %v3977_v55  ;;  %v3999_v55 = vld [vmem:[%s5604_s3 + $0xa0] ss:$8 sps:$4 sm:$0xff]  }
 0x134   :  { %2521 = vmatpush1.bf16.msra.mxu1 %v3975_v58  ;;  %v4004_v58 = vld [vmem:[%s5604_s3 + $0xb4] ss:$8 sps:$4 sm:$0xff]  }
 0x135   :  { %v3438_v53 = vpop.f32.mrb[32].mxu1  ;;  %2522 = vmatprep.subr.bf16.mxu1 %v3980_v2 }
 0x136   :  { %v3439_v54 = vpop.f32.mrb[33].mxu1 }
 0x137   :  { %v3440_v56 = vadd.f32 %v3439_v54, %v3438_v53  ;;  %v3441_v57 = vpop.f32.mrb[34].mxu1 }
 0x138   :  { %v3442_v60 = vpop.f32.mrb[35].mxu1  ;;  %2523 = vmatpush1.bf16.msra.mxu1 %v3978_v5 }
 0x139   :  { %v5228_v62 = vadd.f32 %v3440_v56, %v5144_v61  ;;  %v3443_v63 = vadd.f32 %v3442_v60, %v3441_v57  ;;  %v3983_v61 = vld [vmem:[%s5604_s3 + $0x44] ss:$8 sps:$4 sm:$0xff]  }
 0x13a   :  { %3284 = vmatmul.mubr.msk.bf16.gmra.mrb[28].mxu0 %vm1178_vm0, %v5142_v59  ;;  %2524 = vmatprep.subr.bf16.mxu1 %v3983_v61  ;;  %v4005_v61 = vld [vmem:[%s5604_s3 + $0xc0] ss:$8 sps:$4 sm:$0xff]  }
 0x13b   :  { %v5234_v3 = vadd.f32 %v3443_v63, %v5146_v0  ;;  %v4002_v63 = vld [vmem:[%s5604_s3 + $0xb0] ss:$8 sps:$4 sm:$0xff]  }
 0x13c   :  { %2525 = vmatpush1.bf16.msra.mxu1 %v3981_v11  ;;  %v4010_v11 = vld [vmem:[%s5604_s3 + $0xd4] ss:$8 sps:$4 sm:$0xff]  }
 0x13d   :  { %2526 = vmatprep.subr.bf16.mxu1 %v3986_v15 }
 0x13e   :  { %v3444_v6 = vpop.f32.mrb[36].mxu1 }
 0x13f   :  { %v3445_v59 = vpop.f32.mrb[37].mxu1 }
 0x140   :  { %v3446_v8 = vadd.f32 %v3445_v59, %v3444_v6  ;;  %v3447_v9 = vpop.f32.mrb[38].mxu1  ;;  %2527 = vmatpush1.bf16.msra.mxu1 %v3984_v18 }
 0x141   :  { %v3448_v0 = vpop.f32.mrb[39].mxu1 }
 0x142   :  { %v5246_v12 = vadd.f32 %v3446_v8, %v5151_v4  ;;  %v3449_v14 = vadd.f32 %v3448_v0, %v3447_v9  ;;  %v3989_v4 = vld [vmem:[%s5604_s3 + $0x64] ss:$8 sps:$4 sm:$0xff]  }
 0x143   :  { %2528 = vmatprep.subr.bf16.mxu1 %v3989_v4  ;;  %v4011_v4 = vld [vmem:[%s5604_s3 + $0xe0] ss:$8 sps:$4 sm:$0xff]  }
 0x144   :  { %v5252_v17 = vadd.f32 %v3449_v14, %v5154_v7  ;;  %2529 = vmatpush1.bf16.msra.mxu1 %v3987_v26  ;;  %v4008_v14 = vld [vmem:[%s5604_s3 + $0xd0] ss:$8 sps:$4 sm:$0xff]   ;;  %v4016_v26 = vld [vmem:[%s5604_s3 + $0xf4] ss:$8 sps:$4 sm:$0xff]  }
 0x145   :  { %2530 = vmatprep.subr.bf16.mxu1 %v3992_v30 }
 0x146   :  { %v3450_v20 = vpop.f32.mrb[40].mxu1 }
 0x147   :  { %v3451_v21 = vpop.f32.mrb[41].mxu1 }
 0x148   :  { %v3452_v23 = vadd.f32 %v3451_v21, %v3450_v20  ;;  %v3453_v24 = vpop.f32.mrb[42].mxu1  ;;  %2531 = vmatpush1.bf16.msra.mxu1 %v3990_v33 }
 0x149   :  { %v3454_v7 = vpop.f32.mrb[43].mxu1 }
 0x14a   :  { %v5264_v27 = vadd.f32 %v3452_v23, %v5157_v10  ;;  %v3455_v29 = vadd.f32 %v3454_v7, %v3453_v24  ;;  %v3995_v10 = vld [vmem:[%s5604_s3 + $0x84] ss:$8 sps:$4 sm:$0xff]  }
 0x14b   :  { %2532 = vmatprep.subr.bf16.mxu1 %v3995_v10 }
 0x14c   :  { %v5270_v32 = vadd.f32 %v3455_v29, %v5160_v13  ;;  %2533 = vmatpush1.bf16.msra.mxu1 %v3993_v40  ;;  %v4014_v29 = vld [vmem:[%s5604_s3 + $0xf0] ss:$8 sps:$4 sm:$0xff]  }
 0x14d   :  { %2534 = vmatprep.subr.bf16.mxu1 %v3998_v44 }
 0x14e   :  { %v3456_v35 = vpop.f32.mrb[44].mxu1 }
 0x14f   :  { %v3457_v36 = vpop.f32.mrb[45].mxu1 }
 0x150   :  { %v3458_v38 = vadd.f32 %v3457_v36, %v3456_v35  ;;  %v3459_v39 = vpop.f32.mrb[46].mxu1  ;;  %2535 = vmatpush1.bf16.msra.mxu1 %v3996_v48 }
 0x151   :  { %v3460_v13 = vpop.f32.mrb[47].mxu1 }
 0x152   :  { %v5282_v41 = vadd.f32 %v3458_v38, %v5163_v16  ;;  %v3461_v43 = vadd.f32 %v3460_v13, %v3459_v39  ;;  %v4001_v16 = vld [vmem:[%s5604_s3 + $0xa4] ss:$8 sps:$4 sm:$0xff]  }
 0x153   :  { %2536 = vmatprep.subr.bf16.mxu1 %v4001_v16  ;;  %v4019_v13 = vld [vmem:[%s5604_s3 + $0x104] ss:$8 sps:$4 sm:$0xff]  }
 0x154   :  { %v5288_v45 = vadd.f32 %v3461_v43, %v5166_v19  ;;  %2537 = vmatpush1.bf16.msra.mxu1 %v3999_v55 }
 0x155   :  { %2538 = vmatprep.subr.bf16.mxu1 %v4004_v58 }
 0x156   :  { %v3462_v49 = vpop.f32.mrb[48].mxu1 }
 0x157   :  { %v3463_v50 = vpop.f32.mrb[49].mxu1 }
 0x158   :  { %v3464_v53 = vadd.f32 %v3463_v50, %v3462_v49  ;;  %v3465_v54 = vpop.f32.mrb[50].mxu1  ;;  %2539 = vmatpush1.bf16.msra.mxu1 %v4002_v63 }
 0x159   :  { %v3466_v19 = vpop.f32.mrb[51].mxu1 }
 0x15a   :  { %v5300_v56 = vadd.f32 %v3464_v53, %v5169_v22  ;;  %v3467_v57 = vadd.f32 %v3466_v19, %v3465_v54  ;;  %v4007_v22 = vld [vmem:[%s5604_s3 + $0xc4] ss:$8 sps:$4 sm:$0xff]  }
 0x15b   :  { %2540 = vmatprep.subr.bf16.mxu1 %v4007_v22 }
 0x15c   :  { %v5306_v60 = vadd.f32 %v3467_v57, %v5172_v25  ;;  %2541 = vmatpush1.bf16.msra.mxu1 %v4005_v61 }
 0x15d   :  { %2542 = vmatprep.subr.bf16.mxu1 %v4010_v11 }
 0x15e   :  { %v3468_v2 = vpop.f32.mrb[52].mxu1 }
 0x15f   :  { %v3469_v5 = vpop.f32.mrb[53].mxu1 }
 0x160   :  { %v3470_v6 = vadd.f32 %v3469_v5, %v3468_v2  ;;  %v3471_v59 = vpop.f32.mrb[54].mxu1  ;;  %2543 = vmatpush1.bf16.msra.mxu1 %v4008_v14 }
 0x161   :  { %v3472_v25 = vpop.f32.mrb[55].mxu1 }
 0x162   :  { %v5318_v8 = vadd.f32 %v3470_v6, %v5175_v28  ;;  %v3473_v9 = vadd.f32 %v3472_v25, %v3471_v59  ;;  %v4013_v28 = vld [vmem:[%s5604_s3 + $0xe4] ss:$8 sps:$4 sm:$0xff]  }
 0x163   :  { %2544 = vmatprep.subr.bf16.mxu1 %v4013_v28 }
 0x164   :  { %v5324_v0 = vadd.f32 %v3473_v9, %v5179_v31  ;;  %2545 = vmatpush1.bf16.msra.mxu1 %v4011_v4 }
 0x165   :  { %2546 = vmatprep.subr.bf16.mxu1 %v4016_v26 }
 0x166   :  { %v3474_v15 = vpop.f32.mrb[56].mxu1 }
 0x167   :  { %v3475_v18 = vpop.f32.mrb[57].mxu1 }
 0x168   :  { %v3476_v20 = vadd.f32 %v3475_v18, %v3474_v15  ;;  %v3477_v21 = vpop.f32.mrb[58].mxu1  ;;  %2547 = vmatpush1.bf16.msra.mxu1 %v4014_v29 }
 0x169   :  { %v3478_v31 = vpop.f32.mrb[59].mxu1  ;;  %2629 = vmatprep.subr.bf16.mxu1 %v4019_v13 }
 0x16a   :  { %v5336_v23 = vadd.f32 %v3476_v20, %v5182_v34  ;;  %v3479_v24 = vadd.f32 %v3478_v31, %v3477_v21 }
 0x16c   :  { %v5342_v7 = vadd.f32 %v3479_v24, %v5186_v37 }
 0x16e   :  { %v3480_v30 = vpop.f32.mrb[60].mxu1 }
 0x16f   :  { %v3481_v33 = vpop.f32.mrb[61].mxu1 }
 0x170   :  { %v3482_v35 = vadd.f32 %v3481_v33, %v3480_v30  ;;  %v3483_v34 = vpop.f32.mrb[62].mxu1 }
 0x171   :  { %v3484_v36 = vpop.f32.mrb[63].mxu1 }
 0x172   :  { %v5348_v10 = vadd.f32 %v3482_v35, %v5192_v42  ;;  %v3485_v38 = vadd.f32 %v3484_v36, %v3483_v34 }
 0x174   :  { %v5351_v39 = vadd.f32 %v3485_v38, %v5201_v47 }
 0x176   :  { %v3502_v37 = vpop.f32.mrb[64].mxu1 }
 0x177   :  { %v3503_v40 = vpop.f32.mrb[65].mxu1 }
 0x178   :  { %v3504_v43 = vadd.f32 %v3503_v40, %v3502_v37  ;;  %v3505_v44 = vpop.f32.mrb[66].mxu1 }
 0x179   :  { %v3506_v48 = vpop.f32.mrb[67].mxu1 }
 0x17a   :  { %v3507_v49 = vadd.f32 %v3506_v48, %v3505_v44  ;;  %v5357_v50 = vadd.f32 %v3504_v43, %v5228_v62 }
 0x17c   :  { %v5360_v42 = vadd.f32 %v3507_v49, %v5234_v3 }
 0x17e   :  { %v3508_v16 = vpop.f32.mrb[68].mxu1 }
 0x17f   :  { %v3509_v47 = vpop.f32.mrb[69].mxu1 }
 0x180   :  { %v3510_v53 = vadd.f32 %v3509_v47, %v3508_v16  ;;  %v3511_v54 = vpop.f32.mrb[70].mxu1 }
 0x181   :  { %v3512_v55 = vpop.f32.mrb[71].mxu1 }
 0x182   :  { %v3513_v19 = vadd.f32 %v3512_v55, %v3511_v54  ;;  %v1892_v57 = vadd.f32 %v3510_v53, %v5246_v12  ;;  %v5381_v54 = vsub.s32 0, %v5197_v46 }
 0x184   :  { %v1895_v58 = vadd.f32 %v3513_v19, %v5252_v17 }
 0x186   :  { %v3514_v63 = vpop.f32.mrb[72].mxu1 }
 0x187   :  { %v3515_v2 = vpop.f32.mrb[73].mxu1 }
 0x188   :  { %v3516_v5 = vadd.f32 %v3515_v2, %v3514_v63  ;;  %v3517_v22 = vpop.f32.mrb[74].mxu1 }
 0x189   :  { %v3518_v6 = vpop.f32.mrb[75].mxu1 }
 0x18a   :  { %v3519_v62 = vadd.f32 %v3518_v6, %v3517_v22  ;;  %v1900_v59 = vadd.f32 %v3516_v5, %v5264_v27 }
 0x18c   :  { %v5366_v3 = vadd.f32 %v3519_v62, %v5270_v32 }
 0x18e   :  { %v3520_v61 = vpop.f32.mrb[76].mxu1 }
 0x18f   :  { %v3521_v25 = vpop.f32.mrb[77].mxu1 }
 0x190   :  { %v3522_v9 = vadd.f32 %v3521_v25, %v3520_v61  ;;  %v3523_v11 = vpop.f32.mrb[78].mxu1 }
 0x191   :  { %v3524_v14 = vpop.f32.mrb[79].mxu1 }
 0x192   :  { %v3525_v15 = vadd.f32 %v3524_v14, %v3523_v11  ;;  %v1908_v12 = vadd.f32 %v3522_v9, %v5282_v41 }
 0x194   :  { %v1911_v17 = vadd.f32 %v3525_v15, %v5288_v45 }
 0x196   :  { %v3526_v18 = vpop.f32.mrb[80].mxu1 }
 0x197   :  { %v3527_v28 = vpop.f32.mrb[81].mxu1 }
 0x198   :  { %v3528_v20 = vadd.f32 %v3527_v28, %v3526_v18  ;;  %v3529_v21 = vpop.f32.mrb[82].mxu1 }
 0x199   :  { %v3530_v4 = vpop.f32.mrb[83].mxu1 }
 0x19a   :  { %v3531_v31 = vadd.f32 %v3530_v4, %v3529_v21  ;;  %v1916_v27 = vadd.f32 %v3528_v20, %v5300_v56 }
 0x19c   :  { %v1919_v32 = vadd.f32 %v3531_v31, %v5306_v60 }
 0x19e   :  { %v3532_v24 = vpop.f32.mrb[84].mxu1 }
 0x19f   :  { %v3533_v26 = vpop.f32.mrb[85].mxu1 }
 0x1a0   :  { %v3534_v29 = vadd.f32 %v3533_v26, %v3532_v24  ;;  %v3535_v30 = vpop.f32.mrb[86].mxu1  ;;  %v2075_v24 = vsub.s32 1, %v5197_v46 }
 0x1a1   :  { %v3536_v33 = vpop.f32.mrb[87].mxu1 }
 0x1a2   :  { %v3537_v35 = vadd.f32 %v3536_v33, %v3535_v30  ;;  %v1924_v41 = vadd.f32 %v3534_v29, %v5318_v8  ;;  %v2086_v8 = vpack.c.bf16 %v5217_v52, %v5217_v52  ;;  %v2076_v33 = vrot.slane %v5214_v51, %v2075_v24 }
 0x1a4   :  { %v1927_v45 = vadd.f32 %v3537_v35, %v5324_v0  ;;  %v2102_v55 = vpack.i.b16 %v2086_v8, %v2086_v8 }
 0x1a6   :  { %v3538_v34 = vpop.f32.mrb[88].mxu1  ;;  %v2107_v22 = vrot.slane %v2102_v55, %v5381_v54 }
 0x1a7   :  { %v3539_v36 = vpop.f32.mrb[89].mxu1 }
 0x1a8   :  { %v3540_v38 = vadd.f32 %v3539_v36, %v3538_v34  ;;  %v3541_v37 = vpop.f32.mrb[90].mxu1 }
 0x1a9   :  { %v3542_v40 = vpop.f32.mrb[91].mxu1 }
 0x1aa   :  { %v3543_v13 = vadd.f32 %v3542_v40, %v3541_v37  ;;  %v1932_v56 = vadd.f32 %v3540_v38, %v5336_v23 }
 0x1ac   :  { %v1935_v60 = vadd.f32 %v3543_v13, %v5342_v7 }
 0x1ae   :  { %v3544_v43 = vpop.f32.mrb[92].mxu1 }
 0x1af   :  { %v3545_v44 = vpop.f32.mrb[93].mxu1 }
 0x1b0   :  { %v3546_v48 = vadd.f32 %v3545_v44, %v3544_v43  ;;  %v3547_v49 = vpop.f32.mrb[94].mxu1 }
 0x1b1   :  { %v3548_v16 = vpop.f32.mrb[95].mxu1 }
 0x1b2   :  { %v3549_v47 = vadd.f32 %v3548_v16, %v3547_v49  ;;  %v1940_v0 = vadd.f32 %v3546_v48, %v5348_v10 }
 0x1b4   :  { %v1943_v53 = vadd.f32 %v3549_v47, %v5351_v39 }
 0x1b6   :  { %v3627_v23 = vpop.f32.mrb[96].mxu1 }
 0x1b7   :  { %v1989_v19 = vadd.f32 %v3627_v23, %v1892_v57  ;;  %v1980_v7 = vpop.f32.mrb[97].mxu1 }
 0x1b8   :  { %v1981_v63 = vadd.f32 %v1980_v7, %v5357_v50  ;;  %v3628_v2 = vpop.f32.mrb[98].mxu1 }
 0x1b9   :  { %v1992_v5 = vadd.f32 %v3628_v2, %v1895_v58  ;;  %v1983_v6 = vpop.f32.mrb[99].mxu1 }
 0x1ba   :  { %v1984_v52 = vadd.f32 %v1983_v6, %v5360_v42 }
 0x1bb   :  { %v2048_v62 = vpack.c.bf16 %v1992_v5, %v1989_v19 }
 0x1bc   :  { %v2045_v10 = vpack.c.bf16 %v1984_v52, %v1981_v63 }
 0x1bd   :  { %v5386_v61 = vadd.bf16 %v2107_v22, %v2048_v62 }
 0x1be   :  { %v5388_v39 = vadd.bf16 %v2107_v22, %v2045_v10  ;;  %v3631_v25 = vpop.f32.mrb[100].mxu1 }
 0x1bf   :  { %v2005_v9 = vadd.f32 %v3631_v25, %v1908_v12  ;;  %v1996_v11 = vpop.f32.mrb[101].mxu1 }
 0x1c0   :  { %v1997_v57 = vadd.f32 %v1996_v11, %v1900_v59  ;;  %v3632_v14 = vpop.f32.mrb[102].mxu1 }
 0x1c1   :  { %v2008_v15 = vadd.f32 %v3632_v14, %v1911_v17  ;;  %v1999_v50 = vpop.f32.mrb[103].mxu1  ;;  %v2072_v17 = vrot.slane %v5214_v51, %v5381_v54 }
 0x1c2   :  { %v2000_v58 = vadd.f32 %v1999_v50, %v5366_v3 }
 0x1c3   :  { %v2054_v18 = vpack.c.bf16 %v2008_v15, %v2005_v9  ;;  %v2084_v38 = vpack.c.bf16 %v2072_v17, %v2072_v17 }
 0x1c4   :  { %v2051_v28 = vpack.c.bf16 %v2000_v58, %v1997_v57 }
 0x1c5   :  { %v5391_v20 = vadd.bf16 %v2107_v22, %v2054_v18  ;;  %v2088_v48 = vpack.i.b16 %v2084_v38, %v2084_v38  ;;  %v4017_v38 = vld [vmem:[%s5604_s3 + $0x100] ss:$8 sps:$4 sm:$0xff]  }
 0x1c6   :  { %v5393_v42 = vadd.bf16 %v2107_v22, %v2051_v28  ;;  %v3635_v21 = vpop.f32.mrb[104].mxu1 }
 0x1c7   :  { %v2021_v4 = vadd.f32 %v3635_v21, %v1924_v41  ;;  %v2012_v31 = vpop.f32.mrb[105].mxu1  ;;  %v5410_v19 = vrot.slane %v2088_v48, %v5381_v54  ;;  %v4046_v48 = vld [vmem:[%s5606_s5 + $0x10] sm:$0xff]  }
 0x1c8   :  { %v2013_v26 = vadd.f32 %v2012_v31, %v1916_v27  ;;  %v3636_v12 = vpop.f32.mrb[106].mxu1  ;;  %v4042_v31 = vld [vmem:[%s5606_s5] sm:$0xff]  }
 0x1c9   :  { %v2024_v29 = vadd.f32 %v3636_v12, %v1927_v45  ;;  %v2015_v59 = vpop.f32.mrb[107].mxu1  ;;  %v2085_v45 = vpack.c.bf16 %v2076_v33, %v2076_v33 }
 0x1ca   :  { %v2016_v30 = vadd.f32 %v2015_v59, %v1919_v32 }
 0x1cb   :  { %v2060_v3 = vpack.c.bf16 %v2024_v29, %v2021_v4  ;;  %v2095_v16 = vpack.i.b16 %v2085_v45, %v2085_v45  ;;  %v4041_v4 = vld [vmem:[%s5606_s5 + $0x40] sm:$0xff]  }
 0x1cc   :  { %v2057_v35 = vpack.c.bf16 %v2016_v30, %v2013_v26  ;;  %v4043_v26 = vld [vmem:[%s5606_s5 + $0x48] sm:$0xff]   ;;  %3559 = vmatprep.subr.bf16.mxu0 %v4041_v4  ;;  %v4026_v4 = vld [vmem:[%s5604_s3 + $0x130] ss:$8 sps:$4 sm:$0xff]  }
 0x1cd   :  { %v5401_v34 = vadd.bf16 %v2107_v22, %v2060_v3  ;;  %3560 = vmatpush3.bf16.msra.mxu0 %v4042_v31 }
 0x1ce   :  { %v5403_v41 = vadd.bf16 %v2107_v22, %v2057_v35  ;;  %v3639_v36 = vpop.f32.mrb[108].mxu1  ;;  %v4044_v35 = vld [vmem:[%s5606_s5 + $0x8] sm:$0xff]   ;;  %3561 = vmatprep.subr.bf16.mxu0 %v4043_v26 }
 0x1cf   :  { %v2037_v27 = vadd.f32 %v3639_v36, %v1940_v0  ;;  %v2028_v37 = vpop.f32.mrb[109].mxu1 }
 0x1d0   :  { %v2029_v40 = vadd.f32 %v2028_v37, %v1932_v56  ;;  %v3640_v32 = vpop.f32.mrb[110].mxu1  ;;  %v5413_v56 = vrot.slane %v2095_v16, %v5381_v54 }
 0x1d1   :  { %v2040_v13 = vadd.f32 %v3640_v32, %v1943_v53  ;;  %v2031_v43 = vpop.f32.mrb[111].mxu1  ;;  %3562 = vmatpush3.bf16.msra.mxu0 %v4044_v35 }
 0x1d2   :  { %v2032_v44 = vadd.f32 %v2031_v43, %v1935_v60  ;;  %v4022_v43 = vld [vmem:[%s5604_s3 + $0x114] ss:$8 sps:$4 sm:$0xff]  }
 0x1d3   :  { %v2066_v49 = vpack.c.bf16 %v2040_v13, %v2037_v27  ;;  %v4045_v27 = vld [vmem:[%s5606_s5 + $0x50] sm:$0xff]  }
 0x1d4   :  { %v2063_v8 = vpack.c.bf16 %v2032_v44, %v2029_v40  ;;  %3563 = vmatprep.subr.bf16.mxu0 %v4045_v27 }
 0x1d5   :  { %v5405_v51 = vadd.bf16 %v2107_v22, %v2066_v49  ;;  %v1576_v47 = vpop.f32.mrb[0].mxu0  ;;  %3564 = vmatpush3.bf16.msra.mxu0 %v4046_v48 }
 0x1d6   :  { %v5407_v55 = vadd.bf16 %v2107_v22, %v2063_v8  ;;  %v1578_v23 = vpop.f32.mrb[1].mxu0  ;;  %v4047_v8 = vld [vmem:[%s5606_s5 + $0x58] sm:$0xff]  }
 0x1d7   :  { %v1580_v0 = vpop.f32.mrb[2].mxu0  ;;  %3565 = vmatprep.subr.bf16.mxu0 %v4047_v8  ;;  %v4037_v8 = vld [vmem:[%s5604_s3 + $0x164] ss:$8 sps:$4 sm:$0xff]  }
 0x1d8   :  { %v2043_v53 = vpack.c.bf16 %v1580_v0, %v1576_v47  ;;  %v1582_v7 = vpop.f32.mrb[3].mxu0  ;;  %v4020_v0 = vld [vmem:[%s5604_s3 + $0x110] ss:$8 sps:$4 sm:$0xff]  }
 0x1d9   :  { %v2044_v60 = vpack.c.bf16 %v1582_v7, %v1578_v23 }
 0x1da   :  { %v2108_v63 = vadd.bf16 %v5410_v19, %v2043_v53 }
 0x1db   :  { %v2109_v2 = vadd.bf16 %v5413_v56, %v2044_v60 }
 0x1dc   :  { %v2132_v5 = vmul.bf16 1056980736, %v2108_v63  ;;  %v4025_v63 = vld [vmem:[%s5604_s3 + $0x124] ss:$8 sps:$4 sm:$0xff]  }
 0x1dd   :  { %v2133_v6 = vmul.bf16 1056980736, %v2109_v2  ;;  %v1586_v52 = vpop.f32.mrb[4].mxu0 }
 0x1de   :  { %4057 = vtanh.bf16 %v2132_v5  ;;  %v1588_v22 = vpop.f32.mrb[5].mxu0 }
 0x1df   :  { %4059 = vtanh.bf16 %v2133_v6  ;;  %v1590_v62 = vpop.f32.mrb[6].mxu0  ;;  %v4048_v6 = vld [vmem:[%s5606_s5 + $0x18] sm:$0xff]  }
 0x1e0   :  { %v2046_v10 = vpack.c.bf16 %v1590_v62, %v1586_v52  ;;  %v1592_v25 = vpop.f32.mrb[7].mxu0  ;;  %v4049_v62 = vld [vmem:[%s5606_s5 + $0x60] sm:$0xff]   ;;  %3566 = vmatpush3.bf16.msra.mxu0 %v4048_v6  ;;  %v4040_v6 = vld [vmem:[%s5604_s3 + $0x174] ss:$8 sps:$4 sm:$0xff]  }
 0x1e1   :  { %v2047_v9 = vpack.c.bf16 %v1592_v25, %v1588_v22  ;;  %v4023_v22 = vld [vmem:[%s5604_s3 + $0x120] ss:$8 sps:$4 sm:$0xff]   ;;  %3567 = vmatprep.subr.bf16.mxu0 %v4049_v62 }
 0x1e2   :  { %v2111_v11 = vadd.bf16 %v5410_v19, %v2046_v10 }
 0x1e3   :  { %v2112_v57 = vadd.bf16 %v5413_v56, %v2047_v9 }
 0x1e4   :  { %v2135_v14 = vmul.bf16 1056980736, %v2111_v11 }
 0x1e5   :  { %v2136_v15 = vmul.bf16 1056980736, %v2112_v57  ;;  %v1596_v50 = vpop.f32.mrb[8].mxu0 }
 0x1e6   :  { %4061 = vtanh.bf16 %v2135_v14  ;;  %v1598_v58 = vpop.f32.mrb[9].mxu0  ;;  %v4028_v14 = vld [vmem:[%s5604_s3 + $0x134] ss:$8 sps:$4 sm:$0xff]  }
 0x1e7   :  { %4063 = vtanh.bf16 %v2136_v15  ;;  %v1600_v18 = vpop.f32.mrb[10].mxu0 }
 0x1e8   :  { %v2049_v28 = vpack.c.bf16 %v1600_v18, %v1596_v50  ;;  %v1602_v21 = vpop.f32.mrb[11].mxu0  ;;  %v4050_v50 = vld [vmem:[%s5606_s5 + $0x20] sm:$0xff]  }
 0x1e9   :  { %v4058_v12 = vpop.eup %4057  ;;  %v2050_v29 = vpack.c.bf16 %v1602_v21, %v1598_v58  ;;  %3568 = vmatpush3.bf16.msra.mxu0 %v4050_v50 }
 0x1ea   :  { %v4060_v59 = vpop.eup %4059  ;;  %v2180_v30 = vadd.bf16 1065369472, %v4058_v12  ;;  %v2114_v17 = vadd.bf16 %v5410_v19, %v2049_v28 }
 0x1eb   :  { %v2115_v3 = vadd.bf16 %v5413_v56, %v2050_v29  ;;  %v2181_v33 = vadd.bf16 1065369472, %v4060_v59  ;;  %v4031_v29 = vld [vmem:[%s5604_s3 + $0x144] ss:$8 sps:$4 sm:$0xff]  }
 0x1ec   :  { %v2138_v36 = vmul.bf16 1056980736, %v2114_v17  ;;  %v2204_v32 = vmul.bf16 1056980736, %v2180_v30 }
 0x1ed   :  { %v2139_v37 = vmul.bf16 1056980736, %v2115_v3  ;;  %v1606_v45 = vpop.f32.mrb[12].mxu0  ;;  %v2205_v40 = vmul.bf16 1056980736, %v2181_v33 }
 0x1ee   :  { %4065 = vtanh.bf16 %v2138_v36  ;;  %v1608_v13 = vpop.f32.mrb[13].mxu0  ;;  %v4029_v3 = vld [vmem:[%s5604_s3 + $0x140] ss:$8 sps:$4 sm:$0xff]  }
 0x1ef   :  { %4067 = vtanh.bf16 %v2139_v37  ;;  %v1610_v44 = vpop.f32.mrb[14].mxu0  ;;  %2548 = vmatprep.mubr.bf16.mxu1 %v2205_v40  ;;  %v4034_v37 = vld [vmem:[%s5604_s3 + $0x154] ss:$8 sps:$4 sm:$0xff]  }
 0x1f0   :  { %v2052_v49 = vpack.c.bf16 %v1610_v44, %v1606_v45  ;;  %v1612_v16 = vpop.f32.mrb[15].mxu0  ;;  %2549 = vmatmul.mubr.bf16.vlgmr.msra.gmra.mrb[112].mxu1 %v2204_v32  ;;  %v4032_v44 = vld [vmem:[%s5604_s3 + $0x150] ss:$8 sps:$4 sm:$0xff]  }
 0x1f1   :  { %v4062_v47 = vpop.eup %4061  ;;  %v2053_v23 = vpack.c.bf16 %v1612_v16, %v1608_v13  ;;  %2630 = vmatpush1.bf16.msra.mxu1 %v4017_v38 }
 0x1f2   :  { %v4064_v53 = vpop.eup %4063  ;;  %v2117_v7 = vadd.bf16 %v5410_v19, %v2052_v49  ;;  %v2183_v60 = vadd.bf16 1065369472, %v4062_v47  ;;  %2631 = vmatprep.subr.bf16.mxu1 %v4022_v43 }
 0x1f3   :  { %v2118_v2 = vadd.bf16 %v5413_v56, %v2053_v23  ;;  %v2184_v5 = vadd.bf16 1065369472, %v4064_v53  ;;  %v4035_v53 = vld [vmem:[%s5604_s3 + $0x160] ss:$8 sps:$4 sm:$0xff]  }
 0x1f4   :  { %v2141_v52 = vmul.bf16 1056980736, %v2117_v7  ;;  %v2207_v57 = vmul.bf16 1056980736, %v2183_v60 }
 0x1f5   :  { %v2142_v10 = vmul.bf16 1056980736, %v2118_v2  ;;  %v1616_v25 = vpop.f32.mrb[16].mxu0  ;;  %v2208_v9 = vmul.bf16 1056980736, %v2184_v5  ;;  %2632 = vmatpush1.bf16.msra.mxu1 %v4020_v0 }
 0x1f6   :  { %4069 = vtanh.bf16 %v2141_v52  ;;  %v1618_v11 = vpop.f32.mrb[17].mxu0  ;;  %2633 = vmatprep.subr.bf16.mxu1 %v4025_v63 }
 0x1f7   :  { %4071 = vtanh.bf16 %v2142_v10  ;;  %v1620_v15 = vpop.f32.mrb[18].mxu0  ;;  %2558 = vmatprep.mubr.bf16.mxu1 %v2208_v9  ;;  %v4038_v9 = vld [vmem:[%s5604_s3 + $0x170] ss:$8 sps:$4 sm:$0xff]  }
 0x1f8   :  { %v2055_v58 = vpack.c.bf16 %v1620_v15, %v1616_v25  ;;  %v1622_v18 = vpop.f32.mrb[19].mxu0  ;;  %2559 = vmatmul.mubr.bf16.gmra.mrb[116].mxu1 %v2207_v57 }
 0x1f9   :  { %v4066_v28 = vpop.eup %4065  ;;  %v2056_v21 = vpack.c.bf16 %v1622_v18, %v1618_v11  ;;  %2634 = vmatpush1.bf16.msra.mxu1 %v4023_v22 }
 0x1fa   :  { %v4068_v31 = vpop.eup %4067  ;;  %v2120_v26 = vadd.bf16 %v5410_v19, %v2055_v58  ;;  %v2186_v12 = vadd.bf16 1065369472, %v4066_v28  ;;  %2635 = vmatprep.subr.bf16.mxu1 %v4028_v14 }
 0x1fb   :  { %v2121_v59 = vadd.bf16 %v5413_v56, %v2056_v21  ;;  %v2187_v30 = vadd.bf16 1065369472, %v4068_v31 }
 0x1fc   :  { %v2144_v17 = vmul.bf16 1056980736, %v2120_v26  ;;  %v2210_v27 = vmul.bf16 1056980736, %v2186_v12 }
 0x1fd   :  { %v2145_v33 = vmul.bf16 1056980736, %v2121_v59  ;;  %v1626_v35 = vpop.f32.mrb[20].mxu0  ;;  %v2211_v36 = vmul.bf16 1056980736, %v2187_v30  ;;  %2636 = vmatpush1.bf16.msra.mxu1 %v4026_v4 }
 0x1fe   :  { %4073 = vtanh.bf16 %v2144_v17  ;;  %v1628_v38 = vpop.f32.mrb[21].mxu0  ;;  %2637 = vmatprep.subr.bf16.mxu1 %v4031_v29 }
 0x1ff   :  { %4075 = vtanh.bf16 %v2145_v33  ;;  %v1630_v45 = vpop.f32.mrb[22].mxu0  ;;  %2568 = vmatprep.mubr.bf16.mxu1 %v2211_v36 }
 0x200   :  { %v2058_v40 = vpack.c.bf16 %v1630_v45, %v1626_v35  ;;  %v1632_v32 = vpop.f32.mrb[23].mxu0  ;;  %2569 = vmatmul.mubr.bf16.gmra.mrb[120].mxu1 %v2210_v27 }
 0x201   :  { %v4070_v13 = vpop.eup %4069  ;;  %v2059_v43 = vpack.c.bf16 %v1632_v32, %v1628_v38  ;;  %2638 = vmatpush1.bf16.msra.mxu1 %v4029_v3 }
 0x202   :  { %v4072_v48 = vpop.eup %4071  ;;  %v2123_v49 = vadd.bf16 %v5410_v19, %v2058_v40  ;;  %v2189_v16 = vadd.bf16 1065369472, %v4070_v13  ;;  %2639 = vmatprep.subr.bf16.mxu1 %v4034_v37  ;;  %v2134_v40 = vmul.bf16 1056980736, %v5388_v39 }
 0x203   :  { %v2124_v47 = vadd.bf16 %v5413_v56, %v2059_v43  ;;  %v2190_v23 = vadd.bf16 1065369472, %v4072_v48 }
 0x204   :  { %v2147_v0 = vmul.bf16 1056980736, %v2123_v49  ;;  %v2213_v5 = vmul.bf16 1056980736, %v2189_v16 }
 0x205   :  { %v2148_v7 = vmul.bf16 1056980736, %v2124_v47  ;;  %v1636_v60 = vpop.f32.mrb[24].mxu0  ;;  %v2214_v63 = vmul.bf16 1056980736, %v2190_v23  ;;  %2640 = vmatpush1.bf16.msra.mxu1 %v4032_v44 }
 0x206   :  { %4077 = vtanh.bf16 %v2147_v0  ;;  %v1638_v2 = vpop.f32.mrb[25].mxu0  ;;  %2641 = vmatprep.subr.bf16.mxu1 %v4037_v8 }
 0x207   :  { %4079 = vtanh.bf16 %v2148_v7  ;;  %v1640_v52 = vpop.f32.mrb[26].mxu0  ;;  %2578 = vmatprep.mubr.bf16.mxu1 %v2214_v63 }
 0x208   :  { %v2061_v22 = vpack.c.bf16 %v1640_v52, %v1636_v60  ;;  %v1642_v62 = vpop.f32.mrb[27].mxu0  ;;  %2579 = vmatmul.mubr.bf16.gmra.mrb[124].mxu1 %v2213_v5  ;;  %v2146_v52 = vmul.bf16 1056980736, %v5403_v41 }
 0x209   :  { %v4074_v10 = vpop.eup %4073  ;;  %v2062_v25 = vpack.c.bf16 %v1642_v62, %v1638_v2  ;;  %2642 = vmatpush1.bf16.msra.mxu1 %v4035_v53  ;;  %v2140_v53 = vmul.bf16 1056980736, %v5393_v42 }
 0x20a   :  { %v4076_v11 = vpop.eup %4075  ;;  %v2126_v57 = vadd.bf16 %v5410_v19, %v2061_v22  ;;  %v2192_v14 = vadd.bf16 1065369472, %v4074_v10  ;;  %2643 = vmatprep.subr.bf16.mxu1 %v4040_v6  ;;  %v2149_v10 = vmul.bf16 1056980736, %v5401_v34 }
 0x20b   :  { %v2127_v15 = vadd.bf16 %v5413_v56, %v2062_v25  ;;  %v2193_v50 = vadd.bf16 1065369472, %v4076_v11  ;;  %v2152_v11 = vmul.bf16 1056980736, %v5407_v55 }
 0x20c   :  { %v2150_v58 = vmul.bf16 1056980736, %v2126_v57  ;;  %v2216_v31 = vmul.bf16 1056980736, %v2192_v14 }
 0x20d   :  { %v2151_v18 = vmul.bf16 1056980736, %v2127_v15  ;;  %v1646_v28 = vpop.f32.mrb[28].mxu0  ;;  %v2217_v21 = vmul.bf16 1056980736, %v2193_v50  ;;  %2644 = vmatpush1.bf16.msra.mxu1 %v4038_v9 }
 0x20e   :  { %4081 = vtanh.bf16 %v2150_v58  ;;  %v1648_v4 = vpop.f32.mrb[29].mxu0  ;;  %v2155_v15 = vmul.bf16 1056980736, %v5405_v51  ;;  %v4051_v51 = vld [vmem:[%s5606_s5 + $0x68] sm:$0xff]  }
 0x20f   :  { %4083 = vtanh.bf16 %v2151_v18  ;;  %v1650_v26 = vpop.f32.mrb[30].mxu0  ;;  %2588 = vmatprep.mubr.bf16.mxu1 %v2217_v21  ;;  %3569 = vmatprep.subr.bf16.mxu0 %v4051_v51 }
 0x210   :  { %v2064_v12 = vpack.c.bf16 %v1650_v26, %v1646_v28  ;;  %v1652_v29 = vpop.f32.mrb[31].mxu0  ;;  %2589 = vmatmul.mubr.bf16.gmra.mrb[128].mxu1 %v2216_v31  ;;  %v4052_v31 = vld [vmem:[%s5606_s5 + $0x28] sm:$0xff]   ;;  %v4053_v26 = vld [vmem:[%s5606_s5 + $0x70] sm:$0xff]  }
 0x211   :  { %v4078_v59 = vpop.eup %4077  ;;  %v2065_v30 = vpack.c.bf16 %v1652_v29, %v1648_v4  ;;  %3570 = vmatpush3.bf16.msra.mxu0 %v4052_v31  ;;  %v4056_v29 = vld [vmem:[%s5606_s5 + $0x38] sm:$0xff]  }
 0x212   :  { %v4080_v17 = vpop.eup %4079  ;;  %v2129_v3 = vadd.bf16 %v5410_v19, %v2064_v12  ;;  %v2195_v33 = vadd.bf16 1065369472, %v4078_v59  ;;  %3571 = vmatprep.subr.bf16.mxu0 %v4053_v26  ;;  %v4055_v12 = vld [vmem:[%s5606_s5 + $0x78] sm:$0xff]   ;;  %v2758_v59 = vld [vmem:[%s5605_s4] sm:$0x3] }
 0x213   :  { %v2130_v35 = vadd.bf16 %v5413_v56, %v2065_v30  ;;  %v2196_v36 = vadd.bf16 1065369472, %v4080_v17  ;;  %v2137_v56 = vmul.bf16 1056980736, %v5386_v61  ;;  %v2143_v61 = vmul.bf16 1056980736, %v5391_v20 }
 0x214   :  { %v2153_v38 = vmul.bf16 1056980736, %v2129_v3  ;;  %v2219_v45 = vmul.bf16 1056980736, %v2195_v33  ;;  %v2763_v30 = vrot.slane %v2758_v59, %v5381_v54  ;;  %v2767_v17 = vrot.slane %v2758_v59, %v2075_v24 }
 0x215   :  { %v2154_v27 = vmul.bf16 1056980736, %v2130_v35  ;;  %v2220_v37 = vmul.bf16 1056980736, %v2196_v36 }
 0x216   :  { %4085 = vtanh.bf16 %v2153_v38  ;;  %v2770_v3 = vpack.c.bf16 %v2763_v30, %v2763_v30  ;;  %v2771_v33 = vpack.c.bf16 %v2767_v17, %v2767_v17 }
 0x217   :  { %4087 = vtanh.bf16 %v2154_v27  ;;  %2598 = vmatprep.mubr.bf16.mxu1 %v2220_v37 }
 0x218   :  { %2599 = vmatmul.mubr.bf16.gmra.mrb[132].mxu1 %v2219_v45  ;;  %4089 = vtanh.bf16 %v2134_v40  ;;  %v2773_v35 = vpack.i.b16 %v2770_v3, %v2770_v3  ;;  %v2780_v36 = vpack.i.b16 %v2771_v33, %v2771_v33 }
 0x219   :  { %v4082_v32 = vpop.eup %4081  ;;  %4091 = vtanh.bf16 %v2137_v56 }
 0x21a   :  { %v4084_v13 = vpop.eup %4083  ;;  %v2198_v43 = vadd.bf16 1065369472, %v4082_v32  ;;  %4093 = vtanh.bf16 %v2140_v53  ;;  %v5547_v37 = vrot.slane %v2773_v35, %v5381_v54  ;;  %v5550_v40 = vrot.slane %v2780_v36, %v5381_v54 }
 0x21b   :  { %v2199_v44 = vadd.bf16 1065369472, %v4084_v13  ;;  %4095 = vtanh.bf16 %v2143_v61 }
 0x21c   :  { %v2222_v48 = vmul.bf16 1056980736, %v2198_v43  ;;  %4097 = vtanh.bf16 %v2146_v52 }
 0x21d   :  { %v2223_v19 = vmul.bf16 1056980736, %v2199_v44  ;;  %4099 = vtanh.bf16 %v2149_v10 }
 0x21e   :  { %4101 = vtanh.bf16 %v2152_v11 }
 0x21f   :  { %2608 = vmatprep.mubr.bf16.mxu1 %v2223_v19  ;;  %4103 = vtanh.bf16 %v2155_v15 }
 0x220   :  { %2609 = vmatmul.mubr.bf16.gmra.mrb[136].mxu1 %v2222_v48 }
 0x221   :  { %v4086_v49 = vpop.eup %4085 }
 0x222   :  { %v4088_v16 = vpop.eup %4087  ;;  %v2201_v8 = vadd.bf16 1065369472, %v4086_v49 }
 0x223   :  { %v2202_v47 = vadd.bf16 1065369472, %v4088_v16  ;;  %v4090_v39 = vpop.eup %4089 }
 0x224   :  { %v2225_v0 = vmul.bf16 1056980736, %v2201_v8  ;;  %v2182_v7 = vadd.bf16 1065369472, %v4090_v39  ;;  %v4092_v63 = vpop.eup %4091 }
 0x225   :  { %v2226_v23 = vmul.bf16 1056980736, %v2202_v47  ;;  %v2185_v2 = vadd.bf16 1065369472, %v4092_v63  ;;  %v4094_v6 = vpop.eup %4093 }
 0x226   :  { %v2206_v60 = vmul.bf16 1056980736, %v2182_v7  ;;  %v2188_v42 = vadd.bf16 1065369472, %v4094_v6  ;;  %v4096_v62 = vpop.eup %4095 }
 0x227   :  { %2618 = vmatprep.mubr.bf16.mxu1 %v2226_v23  ;;  %v2209_v5 = vmul.bf16 1056980736, %v2185_v2  ;;  %v2191_v20 = vadd.bf16 1065369472, %v4096_v62  ;;  %v4098_v9 = vpop.eup %4097 }
 0x228   :  { %2619 = vmatmul.mubr.bf16.gmra.mrb[140].mxu1 %v2225_v0  ;;  %v2212_v22 = vmul.bf16 1056980736, %v2188_v42  ;;  %v2194_v41 = vadd.bf16 1065369472, %v4098_v9  ;;  %v4100_v14 = vpop.eup %4099 }
 0x229   :  { %2661 = vmatprep.mubr.bf16.mxu1 %v4161_v1  ;;  %v2215_v25 = vmul.bf16 1056980736, %v2191_v20  ;;  %v2197_v34 = vadd.bf16 1065369472, %v4100_v14  ;;  %v4102_v58 = vpop.eup %4101 }
 0x22a   :  { %v2218_v57 = vmul.bf16 1056980736, %v2194_v41  ;;  %v2200_v55 = vadd.bf16 1065369472, %v4102_v58  ;;  %v4104_v28 = vpop.eup %4103 }
 0x22b   :  { %v2221_v50 = vmul.bf16 1056980736, %v2197_v34  ;;  %v2203_v21 = vadd.bf16 1065369472, %v4104_v28 }
 0x22c   :  { %v2224_v18 = vmul.bf16 1056980736, %v2200_v55 }
 0x22d   :  { %v2227_v4 = vmul.bf16 1056980736, %v2203_v21 }
 0x230   :  { %2662 = vmatmul.mubr.bf16.vlgmr.msra.gmra.mrb[112].mxu1 %v2206_v60 }
 0x231   :  { %2671 = vmatprep.mubr.bf16.mxu1 %v4161_v1 }
 0x238   :  { %2672 = vmatmul.mubr.bf16.gmra.mrb[116].mxu1 %v2209_v5 }
 0x239   :  { %2681 = vmatprep.mubr.bf16.mxu1 %v4161_v1 }
 0x240   :  { %2682 = vmatmul.mubr.bf16.gmra.mrb[120].mxu1 %v2212_v22 }
 0x241   :  { %2691 = vmatprep.mubr.bf16.mxu1 %v4161_v1 }
 0x248   :  { %2692 = vmatmul.mubr.bf16.gmra.mrb[124].mxu1 %v2215_v25 }
 0x249   :  { %2701 = vmatprep.mubr.bf16.mxu1 %v4161_v1 }
 0x250   :  { %2702 = vmatmul.mubr.bf16.gmra.mrb[128].mxu1 %v2218_v57 }
 0x251   :  { %2711 = vmatprep.mubr.bf16.mxu1 %v4161_v1 }
 0x258   :  { %2712 = vmatmul.mubr.bf16.gmra.mrb[132].mxu1 %v2221_v50 }
 0x259   :  { %2721 = vmatprep.mubr.bf16.mxu1 %v4161_v1 }
 0x260   :  { %2722 = vmatmul.mubr.bf16.gmra.mrb[136].mxu1 %v2224_v18 }
 0x261   :  { %2731 = vmatprep.mubr.bf16.mxu1 %v4161_v1  ;;  %v4054_v1 = vld [vmem:[%s5606_s5 + $0x30] sm:$0xff]  }
 0x262   :  { %3572 = vmatpush3.bf16.msra.mxu0 %v4054_v1 }
 0x263   :  { %3573 = vmatprep.subr.bf16.mxu0 %v4055_v12 }
 0x266   :  { %3574 = vmatpush3.bf16.msra.mxu0 %v4056_v29 }
 0x268   :  { %2732 = vmatmul.mubr.bf16.gmra.mrb[140].mxu1 %v2227_v4 }
 0x303   :  { %v2663_v38 = vpop.f32.mrb[112].mxu1 }
 0x304   :  { %v2665_v27 = vpop.f32.mrb[113].mxu1 }
 0x305   :  { %v2667_v45 = vpop.f32.mrb[114].mxu1 }
 0x306   :  { %v2742_v32 = vpack.c.bf16 %v2667_v45, %v2663_v38  ;;  %v2669_v13 = vpop.f32.mrb[115].mxu1 }
 0x307   :  { %v2743_v43 = vpack.c.bf16 %v2669_v13, %v2665_v27 }
 0x308   :  { %v2786_v44 = vadd.bf16 %v5547_v37, %v2742_v32 }
 0x309   :  { %v2787_v46 = vadd.bf16 %v5550_v40, %v2743_v43 }
 0x30a   :  { %v2802_v24 = vmul.bf16 1056980736, %v2786_v44 }
 0x30b   :  { %v2803_v19 = vmul.bf16 1056980736, %v2787_v46  ;;  %v2673_v48 = vpop.f32.mrb[116].mxu1 }
 0x30c   :  { %4105 = vtanh.bf16 %v2802_v24  ;;  %v2675_v56 = vpop.f32.mrb[117].mxu1 }
 0x30d   :  { %4107 = vtanh.bf16 %v2803_v19  ;;  %v2677_v49 = vpop.f32.mrb[118].mxu1 }
 0x30e   :  { %v2744_v16 = vpack.c.bf16 %v2677_v49, %v2673_v48  ;;  %v2679_v8 = vpop.f32.mrb[119].mxu1 }
 0x30f   :  { %v2745_v47 = vpack.c.bf16 %v2679_v8, %v2675_v56 }
 0x310   :  { %v2788_v54 = vadd.bf16 %v5547_v37, %v2744_v16 }
 0x311   :  { %v2789_v23 = vadd.bf16 %v5550_v40, %v2745_v47 }
 0x312   :  { %v2804_v0 = vmul.bf16 1056980736, %v2788_v54 }
 0x313   :  { %v2805_v39 = vmul.bf16 1056980736, %v2789_v23  ;;  %v2683_v53 = vpop.f32.mrb[120].mxu1 }
 0x314   :  { %4109 = vtanh.bf16 %v2804_v0  ;;  %v2685_v7 = vpop.f32.mrb[121].mxu1 }
 0x315   :  { %4111 = vtanh.bf16 %v2805_v39  ;;  %v2687_v60 = vpop.f32.mrb[122].mxu1 }
 0x316   :  { %v2746_v63 = vpack.c.bf16 %v2687_v60, %v2683_v53  ;;  %v2689_v61 = vpop.f32.mrb[123].mxu1 }
 0x317   :  { %v4106_v2 = vpop.eup %4105  ;;  %v2747_v5 = vpack.c.bf16 %v2689_v61, %v2685_v7 }
 0x318   :  { %v4108_v6 = vpop.eup %4107  ;;  %v2834_v52 = vadd.bf16 1065369472, %v4106_v2  ;;  %v2790_v42 = vadd.bf16 %v5547_v37, %v2746_v63 }
 0x319   :  { %v2791_v22 = vadd.bf16 %v5550_v40, %v2747_v5  ;;  %v2835_v62 = vadd.bf16 1065369472, %v4108_v6 }
 0x31a   :  { %v2806_v10 = vmul.bf16 1056980736, %v2790_v42  ;;  %v2850_v11 = vmul.bf16 1056980736, %v2834_v52 }
 0x31b   :  { %v2807_v20 = vmul.bf16 1056980736, %v2791_v22  ;;  %v2693_v25 = vpop.f32.mrb[124].mxu1  ;;  %v2851_v9 = vmul.bf16 1056980736, %v2835_v62 }
 0x31c   :  { %4113 = vtanh.bf16 %v2806_v10  ;;  %v2695_v41 = vpop.f32.mrb[125].mxu1 }
 0x31d   :  { %4115 = vtanh.bf16 %v2807_v20  ;;  %v2697_v57 = vpop.f32.mrb[126].mxu1  ;;  %3033 = vmatprep.mubr.bf16.mxu0 %v2851_v9 }
 0x31e   :  { %v2748_v14 = vpack.c.bf16 %v2697_v57, %v2693_v25  ;;  %v2699_v15 = vpop.f32.mrb[127].mxu1  ;;  %3034 = vmatmul.mubr.bf16.vlgmr.msra.gmra.mrb[32].mxu0 %v2850_v11 }
 0x31f   :  { %v4110_v34 = vpop.eup %4109  ;;  %v2749_v50 = vpack.c.bf16 %v2699_v15, %v2695_v41 }
 0x320   :  { %v4112_v58 = vpop.eup %4111  ;;  %v2792_v55 = vadd.bf16 %v5547_v37, %v2748_v14  ;;  %v2836_v18 = vadd.bf16 1065369472, %v4110_v34 }
 0x321   :  { %v2793_v28 = vadd.bf16 %v5550_v40, %v2749_v50  ;;  %v2837_v21 = vadd.bf16 1065369472, %v4112_v58 }
 0x322   :  { %v2808_v4 = vmul.bf16 1056980736, %v2792_v55  ;;  %v2852_v12 = vmul.bf16 1056980736, %v2836_v18 }
 0x323   :  { %v2809_v51 = vmul.bf16 1056980736, %v2793_v28  ;;  %v2703_v31 = vpop.f32.mrb[128].mxu1  ;;  %v2853_v26 = vmul.bf16 1056980736, %v2837_v21 }
 0x324   :  { %4117 = vtanh.bf16 %v2808_v4  ;;  %v2705_v1 = vpop.f32.mrb[129].mxu1 }
 0x325   :  { %4119 = vtanh.bf16 %v2809_v51  ;;  %v2707_v29 = vpop.f32.mrb[130].mxu1  ;;  %3041 = vmatprep.mubr.bf16.mxu0 %v2853_v26 }
 0x326   :  { %v2750_v59 = vpack.c.bf16 %v2707_v29, %v2703_v31  ;;  %v2709_v30 = vpop.f32.mrb[131].mxu1  ;;  %3042 = vmatmul.mubr.bf16.gmra.mrb[36].mxu0 %v2852_v12 }
 0x327   :  { %v4114_v17 = vpop.eup %4113  ;;  %v2751_v3 = vpack.c.bf16 %v2709_v30, %v2705_v1 }
 0x328   :  { %v4116_v33 = vpop.eup %4115  ;;  %v2794_v35 = vadd.bf16 %v5547_v37, %v2750_v59  ;;  %v2838_v36 = vadd.bf16 1065369472, %v4114_v17 }
 0x329   :  { %v2795_v38 = vadd.bf16 %v5550_v40, %v2751_v3  ;;  %v2839_v27 = vadd.bf16 1065369472, %v4116_v33 }
 0x32a   :  { %v2810_v45 = vmul.bf16 1056980736, %v2794_v35  ;;  %v2854_v46 = vmul.bf16 1056980736, %v2838_v36 }
 0x32b   :  { %v2811_v32 = vmul.bf16 1056980736, %v2795_v38  ;;  %v2713_v13 = vpop.f32.mrb[132].mxu1  ;;  %v2855_v43 = vmul.bf16 1056980736, %v2839_v27 }
 0x32c   :  { %4121 = vtanh.bf16 %v2810_v45  ;;  %v2715_v44 = vpop.f32.mrb[133].mxu1 }
 0x32d   :  { %4123 = vtanh.bf16 %v2811_v32  ;;  %v2717_v24 = vpop.f32.mrb[134].mxu1  ;;  %3049 = vmatprep.mubr.bf16.mxu0 %v2855_v43  ;;  %v5571_v32 = vld [vmem:[%s5607_s6] ss:$0 sm:$0xff]  ;;  %s4162_s6 = smov [#allocation2]  }
 0x32e   :  { %v2752_v19 = vpack.c.bf16 %v2717_v24, %v2713_v13  ;;  %v2719_v48 = vpop.f32.mrb[135].mxu1  ;;  %3050 = vmatmul.mubr.bf16.gmra.mrb[40].mxu0 %v2854_v46  ;;  %s3119_s11 = sshll.u32 %s4162_s6, 4  ;;  %s3120_s11 = int_to_ptr.vmem [resolvable:$true] %s3119_s11 }
 0x32f   :  { %v4118_v56 = vpop.eup %4117  ;;  %v2753_v49 = vpack.c.bf16 %v2719_v48, %v2715_v44  ;;  %s4137_s1 = scalar_lea.vmem %s3120_s11, 2048  ;;  %p4142_p1 = scmp.lt.s32.totalorder %s3120_s11, %s3120_s11 }
 0x330   :  { %v4120_v16 = vpop.eup %4119  ;;  %v2796_v8 = vadd.bf16 %v5547_v37, %v2752_v19  ;;  %v2840_v47 = vadd.bf16 1065369472, %v4118_v56  ;;  %p4138_p0 = scmp.ne.s32.totalorder %s3120_s11, %s4137_s1  ;;  %p4143_p2 = scmp.lt.s32.totalorder %s4137_s1, %s4137_s1 }
 0x331   :  { %v2797_v54 = vadd.bf16 %v5550_v40, %v2753_v49  ;;  %v2841_v23 = vadd.bf16 1065369472, %v4120_v16 }
 0x332   :  { %v2812_v0 = vmul.bf16 1056980736, %v2796_v8  ;;  %v2856_v63 = vmul.bf16 1056980736, %v2840_v47  ;;  %p4144_p3 = por %p4143_p2, %p4142_p1 }
 0x333   :  { %v2813_v39 = vmul.bf16 1056980736, %v2797_v54  ;;  %v2723_v53 = vpop.f32.mrb[136].mxu1  ;;  %v2857_v7 = vmul.bf16 1056980736, %v2841_v23 }
 0x334   :  { %4125 = vtanh.bf16 %v2812_v0  ;;  %v2725_v60 = vpop.f32.mrb[137].mxu1  ;;  %p4145_p4 = pnand %p4144_p3, %p4138_p0 }
 0x335   :  { %4127 = vtanh.bf16 %v2813_v39  ;;  %v2727_v61 = vpop.f32.mrb[138].mxu1  ;;  %3057 = vmatprep.mubr.bf16.mxu0 %v2857_v7 }
 0x336   :  { %v2754_v2 = vpack.c.bf16 %v2727_v61, %v2723_v53  ;;  %v2729_v5 = vpop.f32.mrb[139].mxu1  ;;  %3058 = vmatmul.mubr.bf16.gmra.mrb[44].mxu0 %v2856_v63 }
 0x337   :  { %v4122_v6 = vpop.eup %4121  ;;  %v2755_v52 = vpack.c.bf16 %v2729_v5, %v2725_v60 }
 0x338   :  { %v4124_v42 = vpop.eup %4123  ;;  %v2798_v22 = vadd.bf16 %v5547_v37, %v2754_v2  ;;  %v2842_v62 = vadd.bf16 1065369472, %v4122_v6 }
 0x339   :  { %v2799_v10 = vadd.bf16 %v5550_v40, %v2755_v52  ;;  %v2843_v20 = vadd.bf16 1065369472, %v4124_v42 }
 0x33a   :  { %v2814_v25 = vmul.bf16 1056980736, %v2798_v22  ;;  %v2858_v14 = vmul.bf16 1056980736, %v2842_v62 }
 0x33b   :  { %v2815_v9 = vmul.bf16 1056980736, %v2799_v10  ;;  %v2733_v11 = vpop.f32.mrb[140].mxu1  ;;  %v2859_v41 = vmul.bf16 1056980736, %v2843_v20 }
 0x33c   :  { %4129 = vtanh.bf16 %v2814_v25  ;;  %v2735_v57 = vpop.f32.mrb[141].mxu1 }
 0x33d   :  { %4131 = vtanh.bf16 %v2815_v9  ;;  %v2737_v15 = vpop.f32.mrb[142].mxu1  ;;  %3065 = vmatprep.mubr.bf16.mxu0 %v2859_v41 }
 0x33e   :  { %v2756_v34 = vpack.c.bf16 %v2737_v15, %v2733_v11  ;;  %v2739_v50 = vpop.f32.mrb[143].mxu1  ;;  %3066 = vmatmul.mubr.bf16.gmra.mrb[48].mxu0 %v2858_v14 }
 0x33f   :  { %v4126_v58 = vpop.eup %4125  ;;  %v2757_v55 = vpack.c.bf16 %v2739_v50, %v2735_v57 }
 0x340   :  { %v4128_v18 = vpop.eup %4127  ;;  %v2800_v28 = vadd.bf16 %v5547_v37, %v2756_v34  ;;  %v2844_v21 = vadd.bf16 1065369472, %v4126_v58 }
 0x341   :  { %v2801_v4 = vadd.bf16 %v5550_v40, %v2757_v55  ;;  %v2845_v51 = vadd.bf16 1065369472, %v4128_v18 }
 0x342   :  { %v2816_v31 = vmul.bf16 1056980736, %v2800_v28  ;;  %v2860_v12 = vmul.bf16 1056980736, %v2844_v21 }
 0x343   :  { %v2817_v26 = vmul.bf16 1056980736, %v2801_v4  ;;  %v2861_v1 = vmul.bf16 1056980736, %v2845_v51 }
 0x344   :  { %4133 = vtanh.bf16 %v2816_v31 }
 0x345   :  { %4135 = vtanh.bf16 %v2817_v26  ;;  %3073 = vmatprep.mubr.bf16.mxu0 %v2861_v1 }
 0x346   :  { %3074 = vmatmul.mubr.bf16.gmra.mrb[52].mxu0 %v2860_v12 }
 0x347   :  { %v4130_v29 = vpop.eup %4129 }
 0x348   :  { %v4132_v59 = vpop.eup %4131  ;;  %v2846_v30 = vadd.bf16 1065369472, %v4130_v29 }
 0x349   :  { %v2847_v17 = vadd.bf16 1065369472, %v4132_v59 }
 0x34a   :  { %v2862_v33 = vmul.bf16 1056980736, %v2846_v30 }
 0x34b   :  { %v2863_v3 = vmul.bf16 1056980736, %v2847_v17 }
 0x34d   :  { %3081 = vmatprep.mubr.bf16.mxu0 %v2863_v3 }
 0x34e   :  { %3082 = vmatmul.mubr.bf16.gmra.mrb[56].mxu0 %v2862_v33 }
 0x34f   :  { %v4134_v37 = vpop.eup %4133 }
 0x350   :  { %v4136_v35 = vpop.eup %4135  ;;  %v2848_v40 = vadd.bf16 1065369472, %v4134_v37 }
 0x351   :  { %v2849_v36 = vadd.bf16 1065369472, %v4136_v35 }
 0x352   :  { %v2864_v27 = vmul.bf16 1056980736, %v2848_v40 }
 0x353   :  { %v2865_v38 = vmul.bf16 1056980736, %v2849_v36 }
 0x355   :  { %3089 = vmatprep.mubr.bf16.mxu0 %v2865_v38 }
 0x356   :  { %3090 = vmatmul.mubr.bf16.gmra.mrb[60].mxu0 %v2864_v27 }
 0x3f1   :  { %v3575_v45 = vpop.f32.mrb[32].mxu0 }
 0x3f2   :  { %v3576_v13 = vpop.f32.mrb[33].mxu0 }
 0x3f3   :  { %v3577_v43 = vadd.f32 %v3576_v13, %v3575_v45  ;;  %v3578_v44 = vpop.f32.mrb[34].mxu0 }
 0x3f4   :  { %v3579_v46 = vpop.f32.mrb[35].mxu0 }
 0x3f5   :  { %v3036_v24 = vadd.f32 %v3577_v43, %v5571_v32  ;;  %v3580_v19 = vadd.f32 %v3579_v46, %v3578_v44 }
 0x3f7   :  { %3098 = vst [vmem:[#allocation2] sm:$0xff] %v3036_v24  ;;  %v3039_v48 = vadd.f32 %v3580_v19, %v5571_v32 }
 0x3f9   :  { %3099 = vst [vmem:[#allocation2 + $0x8] sm:$0xff] %v3039_v48  ;;  %v3581_v56 = vpop.f32.mrb[36].mxu0 }
 0x3fa   :  { %v3582_v49 = vpop.f32.mrb[37].mxu0 }
 0x3fb   :  { %v3583_v16 = vadd.f32 %v3582_v49, %v3581_v56  ;;  %v3584_v8 = vpop.f32.mrb[38].mxu0 }
 0x3fc   :  { %v3585_v47 = vpop.f32.mrb[39].mxu0 }
 0x3fd   :  { %v3044_v54 = vadd.f32 %v3583_v16, %v5571_v32  ;;  %v3586_v23 = vadd.f32 %v3585_v47, %v3584_v8 }
 0x3ff   :  { %3100 = vst [vmem:[#allocation2 + $0x10] sm:$0xff] %v3044_v54  ;;  %v3047_v0 = vadd.f32 %v3586_v23, %v5571_v32 }
 0x401   :  { %3101 = vst [vmem:[#allocation2 + $0x18] sm:$0xff] %v3047_v0  ;;  %v3587_v39 = vpop.f32.mrb[40].mxu0 }
 0x402   :  { %v3588_v53 = vpop.f32.mrb[41].mxu0 }
 0x403   :  { %v3589_v7 = vadd.f32 %v3588_v53, %v3587_v39  ;;  %v3590_v60 = vpop.f32.mrb[42].mxu0 }
 0x404   :  { %v3591_v63 = vpop.f32.mrb[43].mxu0 }
 0x405   :  { %v3052_v61 = vadd.f32 %v3589_v7, %v5571_v32  ;;  %v3592_v2 = vadd.f32 %v3591_v63, %v3590_v60 }
 0x407   :  { %3102 = vst [vmem:[#allocation2 + $0x20] sm:$0xff] %v3052_v61  ;;  %v3055_v5 = vadd.f32 %v3592_v2, %v5571_v32 }
 0x409   :  { %3103 = vst [vmem:[#allocation2 + $0x28] sm:$0xff] %v3055_v5  ;;  %v3593_v6 = vpop.f32.mrb[44].mxu0 }
 0x40a   :  { %v3594_v52 = vpop.f32.mrb[45].mxu0 }
 0x40b   :  { %v3595_v42 = vadd.f32 %v3594_v52, %v3593_v6  ;;  %v3596_v22 = vpop.f32.mrb[46].mxu0 }
 0x40c   :  { %v3597_v62 = vpop.f32.mrb[47].mxu0 }
 0x40d   :  { %v3060_v10 = vadd.f32 %v3595_v42, %v5571_v32  ;;  %v3598_v20 = vadd.f32 %v3597_v62, %v3596_v22 }
 0x40f   :  { %3104 = vst [vmem:[#allocation2 + $0x30] sm:$0xff] %v3060_v10  ;;  %v3063_v25 = vadd.f32 %v3598_v20, %v5571_v32 }
 0x411   :  { %3105 = vst [vmem:[#allocation2 + $0x38] sm:$0xff] %v3063_v25  ;;  %v3599_v9 = vpop.f32.mrb[48].mxu0 }
 0x412   :  { %v3600_v11 = vpop.f32.mrb[49].mxu0 }
 0x413   :  { %v3601_v41 = vadd.f32 %v3600_v11, %v3599_v9  ;;  %v3602_v57 = vpop.f32.mrb[50].mxu0 }
 0x414   :  { %v3603_v14 = vpop.f32.mrb[51].mxu0 }
 0x415   :  { %v3068_v15 = vadd.f32 %v3601_v41, %v5571_v32  ;;  %v3604_v34 = vadd.f32 %v3603_v14, %v3602_v57 }
 0x417   :  { %3106 = vst [vmem:[#allocation2 + $0x40] sm:$0xff] %v3068_v15  ;;  %v3071_v50 = vadd.f32 %v3604_v34, %v5571_v32 }
 0x419   :  { %3107 = vst [vmem:[#allocation2 + $0x48] sm:$0xff] %v3071_v50  ;;  %v3605_v58 = vpop.f32.mrb[52].mxu0 }
 0x41a   :  { %v3606_v55 = vpop.f32.mrb[53].mxu0 }
 0x41b   :  { %v3607_v18 = vadd.f32 %v3606_v55, %v3605_v58  ;;  %v3608_v28 = vpop.f32.mrb[54].mxu0 }
 0x41c   :  { %v3609_v21 = vpop.f32.mrb[55].mxu0 }
 0x41d   :  { %v3076_v4 = vadd.f32 %v3607_v18, %v5571_v32  ;;  %v3610_v51 = vadd.f32 %v3609_v21, %v3608_v28 }
 0x41f   :  { %3108 = vst [vmem:[#allocation2 + $0x50] sm:$0xff] %v3076_v4  ;;  %v3079_v31 = vadd.f32 %v3610_v51, %v5571_v32 }
 0x421   :  { %3109 = vst [vmem:[#allocation2 + $0x58] sm:$0xff] %v3079_v31  ;;  %v3611_v26 = vpop.f32.mrb[56].mxu0 }
 0x422   :  { %v3612_v1 = vpop.f32.mrb[57].mxu0 }
 0x423   :  { %v3613_v12 = vadd.f32 %v3612_v1, %v3611_v26  ;;  %v3614_v29 = vpop.f32.mrb[58].mxu0 }
 0x424   :  { %v3615_v59 = vpop.f32.mrb[59].mxu0 }
 0x425   :  { %v3084_v30 = vadd.f32 %v3613_v12, %v5571_v32  ;;  %v3616_v17 = vadd.f32 %v3615_v59, %v3614_v29 }
 0x427   :  { %3110 = vst [vmem:[#allocation2 + $0x60] sm:$0xff] %v3084_v30  ;;  %v3087_v3 = vadd.f32 %v3616_v17, %v5571_v32 }
 0x429   :  { %3111 = vst [vmem:[#allocation2 + $0x68] sm:$0xff] %v3087_v3  ;;  %v3617_v33 = vpop.f32.mrb[60].mxu0 }
 0x42a   :  { %v3618_v37 = vpop.f32.mrb[61].mxu0 }
 0x42b   :  { %v3619_v35 = vadd.f32 %v3618_v37, %v3617_v33  ;;  %v3620_v40 = vpop.f32.mrb[62].mxu0 }
 0x42c   :  { %v3621_v36 = vpop.f32.mrb[63].mxu0 }
 0x42d   :  { %v3092_v38 = vadd.f32 %v3619_v35, %v5571_v32  ;;  %v3622_v27 = vadd.f32 %v3621_v36, %v3620_v40 }
 0x42f   :  { %3112 = vst [vmem:[#allocation2 + $0x70] sm:$0xff] %v3092_v38  ;;  %v3095_v45 = vadd.f32 %v3622_v27, %v5571_v32 }
 0x431   :  { %3113 = vst [vmem:[#allocation2 + $0x78] sm:$0xff] %v3095_v45 }
 0x432   :  { %4148 = shalt.err (!%p4145_p4)
}
 0x433   :  { %s4149_s14 = scalar_lea.hbm %s5608_s7, 2048 }
 0x434   :  { %p4150_p5 = scmp.ne.s32.totalorder %s5608_s7, %s4149_s14  ;;  %p4153_p6 = scmp.lt.u32.totalorder %s4149_s14, %s5608_s7 }
 0x436   :  { %p4155_p7 = pnand %p4153_p6, %p4150_p5 }
 0x438   :  { %4158 = shalt.err (!%p4155_p7)
}
 0x439   :  { %s4163_s19 = smov 128   ;;  %s4164_s20 = smov 8  }
 0x43a   :  { %3125 = dma.vmem_to_hbm [thread:$0]  %s3120_s11, 2048, %s5608_s7, [#allocation3], %s4163_s19, %s4163_s19, %s4164_s20  }
 0x43b   :  { %4159 = dma.done.wait [#allocation3], 2048  }
 0x43c   :  { %4160 = vsyncadd [#allocation3], 4294965248 }
 0x43d   :  { %3129 = vsyncpa [#allocation3], 1 }

</bundles_post_ra>
